<compile_context>
chip_gen: v5e
topology: v5e:2x2
jax: 0.10.0
libtpu: 0.0.40
codegen_flags: <defaults>
</compile_context>

<pallas_src>
import functools

import jax
import jax.numpy as jnp
from jax.experimental import pallas as pl
from jax.experimental.pallas import tpu as pltpu

MS_CFG = [(3, 1), (3, 2), (3, 3), (3, 4), ("max", 3), "1x1"]


def _branch_channels(out_channels, num_branches):
    mid = out_channels // num_branches
    rem = out_channels - mid * (num_branches - 1)
    return [rem] + [mid] * (num_branches - 1)


# ------------------------------ Pallas kernel ------------------------------ #
def _ms_tcn_kernel(T, V, dmax, dilations, cbs, Nb,
                   x_ref, w1s_ref, c1_ref, gate_ref, valid_ref,
                   wt0_ref, wt1_ref, wt2_ref, wt3_ref, bt_ref,
                   rcoef_ref, s2_ref, t2_ref, w3s_ref, c4_ref,
                   o_ref):
    Tp = T + 2 * dmax
    TV = T * V
    loc_len = Tp * V                       # padded local columns per sample

    # ---- sample-invariant parameter prep (hoisted out of the batch loop) ----
    w1s = w1s_ref[...]                     # (OC, Cin)   1x1 conv, BN scale folded
    c1 = c1_ref[...]                       # (OC, 1)     folded bias + BN shift
    gate = gate_ref[...]                   # (OC, 1)     0 -> ReLU, 1 -> identity
    valid = valid_ref[...]                 # (1, ncols)  1 on non-pad columns
    bt = bt_ref[...]                       # (OC, 1)     temporal conv bias
    rcoef = rcoef_ref[...]                 # (T, T*V)    joints_coef selector
    s2 = s2_ref[...]                       # (OC, 1)     bottom BN1 scale
    t2 = t2_ref[...]                       # (OC, 1)     bottom BN1 shift
    w3s = w3s_ref[...]                     # (OC, OC)    bottom conv, BN2 folded
    c4 = c4_ref[...]                       # (OC, 1)     folded bias + BN2 shift
    wt_refs = (wt0_ref, wt1_ref, wt2_ref, wt3_ref)

    offs, o0 = [], 0
    for cb in cbs:
        offs.append(o0)
        o0 += cb

    # per-branch parameter blocks (tiny; sliced once per grid step, not per sample)
    branches = []
    for i, cb in enumerate(cbs):
        off = offs[i]
        p = dict(cb=cb, off=off,
                 s2=s2[off:off + cb], t2=t2[off:off + cb],
                 w3=w3s[:, off:off + cb])
        if i < 4:                                   # dilated temporal-conv branch
            wt = wt_refs[i][...]                    # (cb, 3cb): taps [-d, 0, +d]
            p["taps"] = tuple(wt[:, k * cb:(k + 1) * cb] for k in range(3))
            p["dil"] = dilations[i]
            p["bt"] = bt[off:off + cb]
        branches.append(p)

    for b in range(Nb):                    # static unroll over samples in block
        xs = x_ref[b]                      # (Cin, Tp*V + Tp)

        # stage 1: fused 1x1 conv + eval-mode BN + per-branch (gated) ReLU
        y = jnp.dot(w1s, xs, preferred_element_type=jnp.float32) + c1
        # gate==0 -> max(y, 0) == ReLU ;  gate==1 -> max(y, y) == identity
        mid = jnp.maximum(y, y * gate) * valid      # zero out temporal padding

        # temporal windows: local block has time-stride V, global block stride 1
        def wloc(rows, s):
            return rows[:, (dmax + s) * V:(dmax + s) * V + TV]

        def wglb(rows, s):
            return rows[:, loc_len + dmax + s:loc_len + dmax + s + T]

        acc = None
        for i, p in enumerate(branches):
            cb, off = p["cb"], p["off"]
            rows = mid[off:off + cb]                # (cb, ncols) channel block
            if i < 4:
                # dilated temporal conv: 3 tap matmuls, no tap stacking/concat
                d = p["dil"]
                zl = p["bt"]
                zg = p["bt"]
                for k, s in enumerate((-d, 0, d)):
                    zl = zl + jnp.dot(p["taps"][k], wloc(rows, s),
                                      preferred_element_type=jnp.float32)
                    zg = zg + jnp.dot(p["taps"][k], wglb(rows, s),
                                      preferred_element_type=jnp.float32)
            elif i == 4:
                # maxpool k=3, stride 1, pad 1.  Zero padding is safe because
                # this branch's input is post-ReLU (>= 0), so zeros act like the
                # implicit -inf padding of PyTorch MaxPool2d.
                zl = jnp.maximum(jnp.maximum(wloc(rows, -1), wloc(rows, 0)),
                                 wloc(rows, 1))
                zg = jnp.maximum(jnp.maximum(wglb(rows, -1), wglb(rows, 0)),
                                 wglb(rows, 1))
            else:
                # plain 1x1 branch (stage-1 output passthrough, no BN/ReLU)
                zl = wloc(rows, 0)
                zg = wglb(rows, 0)

            # feat = local + global * joints_coef (coef folded into selector)
            feat = zl + jnp.dot(zg, rcoef, preferred_element_type=jnp.float32)
            # bottom: BN -> ReLU -> 1x1 conv (accumulated per channel block)
            u = jnp.maximum(feat * p["s2"] + p["t2"], 0.0)
            contrib = jnp.dot(p["w3"], u, preferred_element_type=jnp.float32)
            acc = contrib if acc is None else acc + contrib

        # Dropout(p=0) == identity
        o_ref[b] = acc + c4


# ------------------------------ host wrapper ------------------------------- #
def multiscale_tcn(x, params, *, batch_block=None):
    """x: (N, Cin, T, V) NCHW.  Returns (N, OC, T, V) NCHW."""
    N, Cin, T, V = x.shape
    OC = params["w1s"].shape[0]
    dilations = params["dilations"]
    cbs = params["cbs"]
    dmax = max(dilations)
    Tp = T + 2 * dmax
    TV = T * V
    ncols = Tp * (V + 1)

    if batch_block is None:
        Nb = max(d for d in range(1, min(N, 8) + 1) if N % d == 0)
    else:
        Nb = batch_block
    assert N % Nb == 0, (N, Nb)

    xf = x.astype(jnp.float32)
    # global (mean-over-joints) stream == the column torch.cat appends
    xg = jnp.mean(xf, axis=3)                                   # (N, Cin, T)
    xl = jnp.pad(xf, ((0, 0), (0, 0), (dmax, dmax), (0, 0)))    # zero pad time
    xl = xl.reshape(N, Cin, Tp * V)
    xgp = jnp.pad(xg, ((0, 0), (0, 0), (dmax, dmax)))
    xcols = jnp.concatenate([xl, xgp], axis=2)                  # (N, Cin, ncols)

    # joints_coef as (T, T*V) selector: (global @ rcoef)[o, t*V+v] = g[o,t]*coef[v]
    rcoef = jnp.kron(jnp.eye(T, dtype=jnp.float32),
                     params["coef"].reshape(1, V))

    # 0/1 mask of non-padding columns (precomputed; no iota/compares in-kernel)
    vl = jnp.zeros((Tp, V), jnp.float32).at[dmax:dmax + T].set(1.0).reshape(Tp * V)
    vg = jnp.zeros((Tp,), jnp.float32).at[dmax:dmax + T].set(1.0)
    valid = jnp.concatenate([vl, vg]).reshape(1, ncols)

    kernel = functools.partial(_ms_tcn_kernel, T, V, dmax,
                               tuple(dilations), tuple(cbs), Nb)

    def rep(shape):  # whole-array (grid-invariant) block
        return pl.BlockSpec(shape, lambda n: (0,) * len(shape))

    in_specs = [
        pl.BlockSpec((Nb, Cin, ncols), lambda n: (n, 0, 0)),    # x columns
        rep((OC, Cin)),                                         # w1s
        rep((OC, 1)), rep((OC, 1)),                             # c1, gate
        rep((1, ncols)),                                        # valid mask
        *[rep(w.shape) for w in params["wts"]],                 # wt0..wt3
        rep((OC, 1)),                                           # bt
        rep((T, TV)),                                           # rcoef
        rep((OC, 1)), rep((OC, 1)),                             # s2, t2
        rep((OC, OC)),                                          # w3s
        rep((OC, 1)),                                           # c4
    ]
    out_spec = pl.BlockSpec((Nb, OC, TV), lambda n: (n, 0, 0))

    out = pl.pallas_call(
        kernel,
        out_shape=jax.ShapeDtypeStruct((N, OC, TV), jnp.float32),
        grid_spec=pltpu.PrefetchScalarGridSpec(
            num_scalar_prefetch=0,
            grid=(N // Nb,),
            in_specs=in_specs,
            out_specs=out_spec,
        ),
        compiler_params=pltpu.CompilerParams(
            dimension_semantics=("parallel",),      # batch axis -> megacore
            vmem_limit_bytes=32 * 1024 * 1024,      # explicit, v7x-safe budget
        ),
    )(xcols, params["w1s"], params["c1"], params["gate"], valid,
      *params["wts"], params["bt"], rcoef, params["s2"], params["t2"],
      params["w3s"], params["c4"])

    # lane-dense (N, OC, T*V) store; trailing-dim split back to NCHW is free
    return out.reshape(N, OC, T, V)


# --------------------------- deterministic params --------------------------- #
def init_params(key, in_channels, out_channels, num_joints):
    num_branches = len(MS_CFG)
    cbs = _branch_channels(out_channels, num_branches)
    dilations = tuple(c[1] for c in MS_CFG if isinstance(c, tuple) and c[0] == 3)
    eps = 1e-5
    OC, Cin, V = out_channels, in_channels, num_joints

    keys = iter(jax.random.split(key, 64))

    def rnd(shape, scale=0.1):
        return jax.random.normal(next(keys), shape, jnp.float32) * scale

    def bn(c):  # folded eval-mode BatchNorm2d -> (scale, shift)
        gamma = 1.0 + rnd((c,))
        beta = rnd((c,))
        rmean = rnd((c,))
        rvar = jnp.abs(1.0 + rnd((c,)))
        scale = gamma / jnp.sqrt(rvar + eps)
        return scale, beta - rmean * scale

    w1s = jnp.zeros((OC, Cin), jnp.float32)   # 1x1 conv weight, BN scale folded
    c1 = jnp.zeros((OC,), jnp.float32)        # folded conv bias + BN shift
    gate = jnp.zeros((OC,), jnp.float32)      # 0 -> ReLU applied, 1 -> identity
    bt = jnp.zeros((OC,), jnp.float32)        # temporal conv bias
    wts = []

    off = 0
    for i, cfg in enumerate(MS_CFG):
        cb = cbs[i]
        sl = slice(off, off + cb)
        w = rnd((cb, Cin))                    # Conv2d 1x1 weight (out, in)
        b = rnd((cb,))
        if cfg == "1x1":
            w1s = w1s.at[sl].set(w)
            c1 = c1.at[sl].set(b)
            gate = gate.at[sl].set(1.0)       # no BN / no ReLU for this branch
        else:
            sc, sh = bn(cb)
            w1s = w1s.at[sl].set(w * sc[:, None])
            c1 = c1.at[sl].set(b * sc + sh)
            if isinstance(cfg, tuple) and cfg[0] == 3:
                # TemporalConv2d: Conv2d(cb, cb, (3,1), dilation=(d,1), pad=(d,0))
                wk = rnd((cb, cb, 3))         # (out, in, tap)
                wts.append(jnp.concatenate([wk[:, :, k] for k in range(3)], axis=1))
                bt = bt.at[sl].set(rnd((cb,)))
        off += cb

    # joints_coef: module inits to zeros; deterministic nonzero values so the
    # global/local mixing path is actually exercised.
    coef = rnd((V,), scale=0.5)

    s2, t2 = bn(OC)                           # bottom BN1
    w3 = rnd((OC, OC))                        # bottom 1x1 conv (out, in)
    b3 = rnd((OC,))
    s4, t4 = bn(OC)                           # bottom BN2 -> fold into conv
    w3s = w3 * s4[:, None]
    c4 = b3 * s4 + t4

    col = lambda a: a.reshape(-1, 1)
    return dict(
        w1s=w1s, c1=col(c1), gate=col(gate), wts=tuple(wts), bt=col(bt),
        coef=coef, s2=col(s2), t2=col(t2), w3s=w3s, c4=col(c4),
        dilations=dilations, cbs=tuple(cbs),
    )


# ------------------------------ pure-JAX reference -------------------------- #
def multiscale_tcn_reference(x, params):
    """Plain-JAX NCHW reference of the eval-mode forward (same folded params)."""
    N, Cin, T, V = x.shape
    OC = params["w1s"].shape[0]
    dils = params["dilations"]
    cbs = params["cbs"]
    hp = jax.lax.Precision.HIGHEST

    def pc(a):  # per-channel column -> NCHW broadcast
        return a.reshape(1, -1, 1, 1)

    xc = jnp.concatenate([x, x.mean(axis=3, keepdims=True)], axis=3)
    y = jnp.einsum("oc,nctv->notv", params["w1s"], xc, precision=hp) + pc(params["c1"])
    mid = jnp.maximum(y, y * pc(params["gate"]))

    offs = [0]
    for cb in cbs:
        offs.append(offs[-1] + cb)

    outs = []
    for i, d in enumerate(dils):
        cb = cbs[i]
        m = mid[:, offs[i]:offs[i] + cb]
        mp = jnp.pad(m, ((0, 0), (0, 0), (d, d), (0, 0)))       # conv zero pad
        wt = params["wts"][i]
        acc = 0.0
        for k in range(3):
            wk = wt[:, k * cb:(k + 1) * cb]
            acc = acc + jnp.einsum("oc,nctv->notv", wk,
                                   mp[:, :, k * d:k * d + T, :], precision=hp)
        outs.append(acc + params["bt"][offs[i]:offs[i] + cb].reshape(1, cb, 1, 1))
    cb = cbs[4]
    m = mid[:, offs[4]:offs[4] + cb]
    mp = jnp.pad(m, ((0, 0), (0, 0), (1, 1), (0, 0)),
                 constant_values=-jnp.inf)                      # MaxPool2d pad
    outs.append(jnp.maximum(jnp.maximum(mp[:, :, 0:T], mp[:, :, 1:T + 1]),
                            mp[:, :, 2:T + 2]))
    outs.append(mid[:, offs[5]:offs[5] + cbs[5]])
    out = jnp.concatenate(outs, axis=1)                         # (N, OC, T, V+1)

    feat = out[..., :V] + out[..., V:] * params["coef"].reshape(1, 1, 1, V)
    u = jnp.maximum(feat * pc(params["s2"]) + pc(params["t2"]), 0.0)
    return jnp.einsum("oc,nctv->notv", params["w3s"], u, precision=hp) + pc(params["c4"])


if __name__ == "__main__":
    key = jax.random.PRNGKey(0)
    kx, kp = jax.random.split(key)

    # small shapes: batch=4, in_channels=4, T=16, num_joints(V)=8, out_channels=12
    N, Cin, T, V = 4, 4, 16, 8
    OC = 12  # 6 branches -> mid=2, rem=2

    x = jax.random.normal(kx, (N, Cin, T, V), jnp.float32)
    params = init_params(kp, Cin, OC, V)

    out = multiscale_tcn(x, params, batch_block=2)   # grid=(2,), 2 samples/step
    out = jax.block_until_ready(out)
    assert out.shape == (N, OC, T, V), out.shape
    assert bool(jnp.all(jnp.isfinite(out)))

    ref = multiscale_tcn_reference(x, params)
    err = float(jnp.max(jnp.abs(out - ref)))
    # tolerance covers MXU vs HIGHEST-precision XLA reference; bugs give O(0.1)
    assert err < 2e-2, f"max |kernel - reference| = {err}"
    print("KERNEL_OK")
</pallas_src>

<mosaic_0001>
module attributes {stable_mosaic.version = 11 : i64} {
  func.func @_ms_tcn_kernel(%arg0: i32, %arg1: memref<2x4x216xf32, #tpu.memory_space<vmem>>, %arg2: memref<12x4xf32, #tpu.memory_space<vmem>>, %arg3: memref<12x1xf32, #tpu.memory_space<vmem>>, %arg4: memref<12x1xf32, #tpu.memory_space<vmem>>, %arg5: memref<1x216xf32, #tpu.memory_space<vmem>>, %arg6: memref<2x6xf32, #tpu.memory_space<vmem>>, %arg7: memref<2x6xf32, #tpu.memory_space<vmem>>, %arg8: memref<2x6xf32, #tpu.memory_space<vmem>>, %arg9: memref<2x6xf32, #tpu.memory_space<vmem>>, %arg10: memref<12x1xf32, #tpu.memory_space<vmem>>, %arg11: memref<16x128xf32, #tpu.memory_space<vmem>>, %arg12: memref<12x1xf32, #tpu.memory_space<vmem>>, %arg13: memref<12x1xf32, #tpu.memory_space<vmem>>, %arg14: memref<12x12xf32, #tpu.memory_space<vmem>>, %arg15: memref<12x1xf32, #tpu.memory_space<vmem>>, %arg16: memref<2x12x128xf32, #tpu.memory_space<vmem>>) attributes {dimension_semantics = [#tpu.dimension_semantics<parallel>], iteration_bounds = array<i64: 2>, scalar_prefetch = 0 : i64, scratch_operands = 0 : i64, tpu.core_type = #tpu.core_type<tc>, window_params = [{transform_indices = @transform_0, window_bounds = array<i64: 2, 4, 216>}, {pipeline_mode = #tpu.pipeline_mode<synchronous>, transform_indices = @transform_1, window_bounds = array<i64: 12, 4>}, {pipeline_mode = #tpu.pipeline_mode<synchronous>, transform_indices = @transform_2, window_bounds = array<i64: 12, 1>}, {pipeline_mode = #tpu.pipeline_mode<synchronous>, transform_indices = @transform_3, window_bounds = array<i64: 12, 1>}, {pipeline_mode = #tpu.pipeline_mode<synchronous>, transform_indices = @transform_4, window_bounds = array<i64: 1, 216>}, {pipeline_mode = #tpu.pipeline_mode<synchronous>, transform_indices = @transform_5, window_bounds = array<i64: 2, 6>}, {pipeline_mode = #tpu.pipeline_mode<synchronous>, transform_indices = @transform_6, window_bounds = array<i64: 2, 6>}, {pipeline_mode = #tpu.pipeline_mode<synchronous>, transform_indices = @transform_7, window_bounds = array<i64: 2, 6>}, {pipeline_mode = #tpu.pipeline_mode<synchronous>, transform_indices = @transform_8, window_bounds = array<i64: 2, 6>}, {pipeline_mode = #tpu.pipeline_mode<synchronous>, transform_indices = @transform_9, window_bounds = array<i64: 12, 1>}, {pipeline_mode = #tpu.pipeline_mode<synchronous>, transform_indices = @transform_10, window_bounds = array<i64: 16, 128>}, {pipeline_mode = #tpu.pipeline_mode<synchronous>, transform_indices = @transform_11, window_bounds = array<i64: 12, 1>}, {pipeline_mode = #tpu.pipeline_mode<synchronous>, transform_indices = @transform_12, window_bounds = array<i64: 12, 1>}, {pipeline_mode = #tpu.pipeline_mode<synchronous>, transform_indices = @transform_13, window_bounds = array<i64: 12, 12>}, {pipeline_mode = #tpu.pipeline_mode<synchronous>, transform_indices = @transform_14, window_bounds = array<i64: 12, 1>}, {transform_indices = @transform_15, window_bounds = array<i64: 2, 12, 128>}]} {
    %c0 = arith.constant 0 : index
    %c0_0 = arith.constant 0 : index
    %0 = vector.load %arg2[%c0, %c0_0] : memref<12x4xf32, #tpu.memory_space<vmem>>, vector<12x4xf32>
    %c0_1 = arith.constant 0 : index
    %c0_2 = arith.constant 0 : index
    %1 = vector.load %arg3[%c0_1, %c0_2] : memref<12x1xf32, #tpu.memory_space<vmem>>, vector<12x1xf32>
    %c0_3 = arith.constant 0 : index
    %c0_4 = arith.constant 0 : index
    %2 = vector.load %arg4[%c0_3, %c0_4] : memref<12x1xf32, #tpu.memory_space<vmem>>, vector<12x1xf32>
    %c0_5 = arith.constant 0 : index
    %c0_6 = arith.constant 0 : index
    %3 = vector.load %arg5[%c0_5, %c0_6] : memref<1x216xf32, #tpu.memory_space<vmem>>, vector<1x216xf32>
    %c0_7 = arith.constant 0 : index
    %c0_8 = arith.constant 0 : index
    %4 = vector.load %arg10[%c0_7, %c0_8] : memref<12x1xf32, #tpu.memory_space<vmem>>, vector<12x1xf32>
    %c0_9 = arith.constant 0 : index
    %c0_10 = arith.constant 0 : index
    %5 = vector.load %arg11[%c0_9, %c0_10] : memref<16x128xf32, #tpu.memory_space<vmem>>, vector<16x128xf32>
    %c0_11 = arith.constant 0 : index
    %c0_12 = arith.constant 0 : index
    %6 = vector.load %arg12[%c0_11, %c0_12] : memref<12x1xf32, #tpu.memory_space<vmem>>, vector<12x1xf32>
    %c0_13 = arith.constant 0 : index
    %c0_14 = arith.constant 0 : index
    %7 = vector.load %arg13[%c0_13, %c0_14] : memref<12x1xf32, #tpu.memory_space<vmem>>, vector<12x1xf32>
    %c0_15 = arith.constant 0 : index
    %c0_16 = arith.constant 0 : index
    %8 = vector.load %arg14[%c0_15, %c0_16] : memref<12x12xf32, #tpu.memory_space<vmem>>, vector<12x12xf32>
    %c0_17 = arith.constant 0 : index
    %c0_18 = arith.constant 0 : index
    %9 = vector.load %arg15[%c0_17, %c0_18] : memref<12x1xf32, #tpu.memory_space<vmem>>, vector<12x1xf32>
    %10 = vector.extract_strided_slice %6 {offsets = [0, 0], sizes = [2, 1], strides = [1, 1]} : vector<12x1xf32> to vector<2x1xf32>
    %11 = vector.extract_strided_slice %7 {offsets = [0, 0], sizes = [2, 1], strides = [1, 1]} : vector<12x1xf32> to vector<2x1xf32>
    %12 = vector.extract_strided_slice %8 {offsets = [0, 0], sizes = [12, 2], strides = [1, 1]} : vector<12x12xf32> to vector<12x2xf32>
    %c0_19 = arith.constant 0 : index
    %c0_20 = arith.constant 0 : index
    %13 = vector.load %arg6[%c0_19, %c0_20] : memref<2x6xf32, #tpu.memory_space<vmem>>, vector<2x6xf32>
    %14 = vector.extract_strided_slice %13 {offsets = [0, 0], sizes = [2, 2], strides = [1, 1]} : vector<2x6xf32> to vector<2x2xf32>
    %15 = vector.extract_strided_slice %13 {offsets = [0, 2], sizes = [2, 2], strides = [1, 1]} : vector<2x6xf32> to vector<2x2xf32>
    %16 = vector.extract_strided_slice %13 {offsets = [0, 4], sizes = [2, 2], strides = [1, 1]} : vector<2x6xf32> to vector<2x2xf32>
    %17 = vector.extract_strided_slice %4 {offsets = [0, 0], sizes = [2, 1], strides = [1, 1]} : vector<12x1xf32> to vector<2x1xf32>
    %18 = vector.extract_strided_slice %6 {offsets = [2, 0], sizes = [2, 1], strides = [1, 1]} : vector<12x1xf32> to vector<2x1xf32>
    %19 = vector.extract_strided_slice %7 {offsets = [2, 0], sizes = [2, 1], strides = [1, 1]} : vector<12x1xf32> to vector<2x1xf32>
    %20 = vector.extract_strided_slice %8 {offsets = [0, 2], sizes = [12, 2], strides = [1, 1]} : vector<12x12xf32> to vector<12x2xf32>
    %c0_21 = arith.constant 0 : index
    %c0_22 = arith.constant 0 : index
    %21 = vector.load %arg7[%c0_21, %c0_22] : memref<2x6xf32, #tpu.memory_space<vmem>>, vector<2x6xf32>
    %22 = vector.extract_strided_slice %21 {offsets = [0, 0], sizes = [2, 2], strides = [1, 1]} : vector<2x6xf32> to vector<2x2xf32>
    %23 = vector.extract_strided_slice %21 {offsets = [0, 2], sizes = [2, 2], strides = [1, 1]} : vector<2x6xf32> to vector<2x2xf32>
    %24 = vector.extract_strided_slice %21 {offsets = [0, 4], sizes = [2, 2], strides = [1, 1]} : vector<2x6xf32> to vector<2x2xf32>
    %25 = vector.extract_strided_slice %4 {offsets = [2, 0], sizes = [2, 1], strides = [1, 1]} : vector<12x1xf32> to vector<2x1xf32>
    %26 = vector.extract_strided_slice %6 {offsets = [4, 0], sizes = [2, 1], strides = [1, 1]} : vector<12x1xf32> to vector<2x1xf32>
    %27 = vector.extract_strided_slice %7 {offsets = [4, 0], sizes = [2, 1], strides = [1, 1]} : vector<12x1xf32> to vector<2x1xf32>
    %28 = vector.extract_strided_slice %8 {offsets = [0, 4], sizes = [12, 2], strides = [1, 1]} : vector<12x12xf32> to vector<12x2xf32>
    %c0_23 = arith.constant 0 : index
    %c0_24 = arith.constant 0 : index
    %29 = vector.load %arg8[%c0_23, %c0_24] : memref<2x6xf32, #tpu.memory_space<vmem>>, vector<2x6xf32>
    %30 = vector.extract_strided_slice %29 {offsets = [0, 0], sizes = [2, 2], strides = [1, 1]} : vector<2x6xf32> to vector<2x2xf32>
    %31 = vector.extract_strided_slice %29 {offsets = [0, 2], sizes = [2, 2], strides = [1, 1]} : vector<2x6xf32> to vector<2x2xf32>
    %32 = vector.extract_strided_slice %29 {offsets = [0, 4], sizes = [2, 2], strides = [1, 1]} : vector<2x6xf32> to vector<2x2xf32>
    %33 = vector.extract_strided_slice %4 {offsets = [4, 0], sizes = [2, 1], strides = [1, 1]} : vector<12x1xf32> to vector<2x1xf32>
    %34 = vector.extract_strided_slice %6 {offsets = [6, 0], sizes = [2, 1], strides = [1, 1]} : vector<12x1xf32> to vector<2x1xf32>
    %35 = vector.extract_strided_slice %7 {offsets = [6, 0], sizes = [2, 1], strides = [1, 1]} : vector<12x1xf32> to vector<2x1xf32>
    %36 = vector.extract_strided_slice %8 {offsets = [0, 6], sizes = [12, 2], strides = [1, 1]} : vector<12x12xf32> to vector<12x2xf32>
    %c0_25 = arith.constant 0 : index
    %c0_26 = arith.constant 0 : index
    %37 = vector.load %arg9[%c0_25, %c0_26] : memref<2x6xf32, #tpu.memory_space<vmem>>, vector<2x6xf32>
    %38 = vector.extract_strided_slice %37 {offsets = [0, 0], sizes = [2, 2], strides = [1, 1]} : vector<2x6xf32> to vector<2x2xf32>
    %39 = vector.extract_strided_slice %37 {offsets = [0, 2], sizes = [2, 2], strides = [1, 1]} : vector<2x6xf32> to vector<2x2xf32>
    %40 = vector.extract_strided_slice %37 {offsets = [0, 4], sizes = [2, 2], strides = [1, 1]} : vector<2x6xf32> to vector<2x2xf32>
    %41 = vector.extract_strided_slice %4 {offsets = [6, 0], sizes = [2, 1], strides = [1, 1]} : vector<12x1xf32> to vector<2x1xf32>
    %42 = vector.extract_strided_slice %6 {offsets = [8, 0], sizes = [2, 1], strides = [1, 1]} : vector<12x1xf32> to vector<2x1xf32>
    %43 = vector.extract_strided_slice %7 {offsets = [8, 0], sizes = [2, 1], strides = [1, 1]} : vector<12x1xf32> to vector<2x1xf32>
    %44 = vector.extract_strided_slice %8 {offsets = [0, 8], sizes = [12, 2], strides = [1, 1]} : vector<12x12xf32> to vector<12x2xf32>
    %45 = vector.extract_strided_slice %6 {offsets = [10, 0], sizes = [2, 1], strides = [1, 1]} : vector<12x1xf32> to vector<2x1xf32>
    %46 = vector.extract_strided_slice %7 {offsets = [10, 0], sizes = [2, 1], strides = [1, 1]} : vector<12x1xf32> to vector<2x1xf32>
    %47 = vector.extract_strided_slice %8 {offsets = [0, 10], sizes = [12, 2], strides = [1, 1]} : vector<12x12xf32> to vector<12x2xf32>
    %c0_27 = arith.constant 0 : index
    %c0_28 = arith.constant 0 : index
    %c0_29 = arith.constant 0 : index
    %48 = vector.load %arg1[%c0_27, %c0_28, %c0_29] : memref<2x4x216xf32, #tpu.memory_space<vmem>>, vector<1x4x216xf32>
    %49 = vector.shape_cast %48 : vector<1x4x216xf32> to vector<4x216xf32>
    %cst = arith.constant dense<0.000000e+00> : vector<12x216xf32>
    %50 = tpu.matmul %0, %49, %cst {dimension_numbers = #tpu.dot_dimension_numbers<[1], [0], [0], [1], [0, 0, 1, 1], [], []>} : vector<12x4xf32>, vector<4x216xf32>, vector<12x216xf32> -> vector<12x216xf32>
    %51 = vector.broadcast %1 : vector<12x1xf32> to vector<12x216xf32>
    %52 = arith.addf %50, %51 : vector<12x216xf32>
    %53 = vector.broadcast %2 : vector<12x1xf32> to vector<12x216xf32>
    %54 = arith.mulf %52, %53 : vector<12x216xf32>
    %55 = arith.maximumf %52, %54 : vector<12x216xf32>
    %56 = vector.broadcast %3 : vector<1x216xf32> to vector<12x216xf32>
    %57 = arith.mulf %55, %56 : vector<12x216xf32>
    %58 = vector.extract_strided_slice %57 {offsets = [0, 0], sizes = [2, 216], strides = [1, 1]} : vector<12x216xf32> to vector<2x216xf32>
    %59 = vector.extract_strided_slice %58 {offsets = [0, 24], sizes = [2, 128], strides = [1, 1]} : vector<2x216xf32> to vector<2x128xf32>
    %cst_30 = arith.constant dense<0.000000e+00> : vector<2x128xf32>
    %60 = tpu.matmul %14, %59, %cst_30 {dimension_numbers = #tpu.dot_dimension_numbers<[1], [0], [0], [1], [0, 0, 1, 1], [], []>} : vector<2x2xf32>, vector<2x128xf32>, vector<2x128xf32> -> vector<2x128xf32>
    %61 = vector.broadcast %17 : vector<2x1xf32> to vector<2x128xf32>
    %62 = arith.addf %61, %60 : vector<2x128xf32>
    %63 = vector.extract_strided_slice %58 {offsets = [0, 195], sizes = [2, 16], strides = [1, 1]} : vector<2x216xf32> to vector<2x16xf32>
    %cst_31 = arith.constant dense<0.000000e+00> : vector<2x16xf32>
    %64 = tpu.matmul %14, %63, %cst_31 {dimension_numbers = #tpu.dot_dimension_numbers<[1], [0], [0], [1], [0, 0, 1, 1], [], []>} : vector<2x2xf32>, vector<2x16xf32>, vector<2x16xf32> -> vector<2x16xf32>
    %65 = vector.broadcast %17 : vector<2x1xf32> to vector<2x16xf32>
    %66 = arith.addf %65, %64 : vector<2x16xf32>
    %67 = vector.extract_strided_slice %58 {offsets = [0, 32], sizes = [2, 128], strides = [1, 1]} : vector<2x216xf32> to vector<2x128xf32>
    %cst_32 = arith.constant dense<0.000000e+00> : vector<2x128xf32>
    %68 = tpu.matmul %15, %67, %cst_32 {dimension_numbers = #tpu.dot_dimension_numbers<[1], [0], [0], [1], [0, 0, 1, 1], [], []>} : vector<2x2xf32>, vector<2x128xf32>, vector<2x128xf32> -> vector<2x128xf32>
    %69 = arith.addf %62, %68 : vector<2x128xf32>
    %70 = vector.extract_strided_slice %58 {offsets = [0, 196], sizes = [2, 16], strides = [1, 1]} : vector<2x216xf32> to vector<2x16xf32>
    %cst_33 = arith.constant dense<0.000000e+00> : vector<2x16xf32>
    %71 = tpu.matmul %15, %70, %cst_33 {dimension_numbers = #tpu.dot_dimension_numbers<[1], [0], [0], [1], [0, 0, 1, 1], [], []>} : vector<2x2xf32>, vector<2x16xf32>, vector<2x16xf32> -> vector<2x16xf32>
    %72 = arith.addf %66, %71 : vector<2x16xf32>
    %73 = vector.extract_strided_slice %58 {offsets = [0, 40], sizes = [2, 128], strides = [1, 1]} : vector<2x216xf32> to vector<2x128xf32>
    %cst_34 = arith.constant dense<0.000000e+00> : vector<2x128xf32>
    %74 = tpu.matmul %16, %73, %cst_34 {dimension_numbers = #tpu.dot_dimension_numbers<[1], [0], [0], [1], [0, 0, 1, 1], [], []>} : vector<2x2xf32>, vector<2x128xf32>, vector<2x128xf32> -> vector<2x128xf32>
    %75 = arith.addf %69, %74 : vector<2x128xf32>
    %76 = vector.extract_strided_slice %58 {offsets = [0, 197], sizes = [2, 16], strides = [1, 1]} : vector<2x216xf32> to vector<2x16xf32>
    %cst_35 = arith.constant dense<0.000000e+00> : vector<2x16xf32>
    %77 = tpu.matmul %16, %76, %cst_35 {dimension_numbers = #tpu.dot_dimension_numbers<[1], [0], [0], [1], [0, 0, 1, 1], [], []>} : vector<2x2xf32>, vector<2x16xf32>, vector<2x16xf32> -> vector<2x16xf32>
    %78 = arith.addf %72, %77 : vector<2x16xf32>
    %cst_36 = arith.constant dense<0.000000e+00> : vector<2x128xf32>
    %79 = tpu.matmul %78, %5, %cst_36 {dimension_numbers = #tpu.dot_dimension_numbers<[1], [0], [0], [1], [0, 0, 1, 1], [], []>} : vector<2x16xf32>, vector<16x128xf32>, vector<2x128xf32> -> vector<2x128xf32>
    %80 = arith.addf %75, %79 : vector<2x128xf32>
    %81 = vector.broadcast %10 : vector<2x1xf32> to vector<2x128xf32>
    %82 = arith.mulf %80, %81 : vector<2x128xf32>
    %83 = vector.broadcast %11 : vector<2x1xf32> to vector<2x128xf32>
    %84 = arith.addf %82, %83 : vector<2x128xf32>
    %cst_37 = arith.constant 0.000000e+00 : f32
    %85 = vector.broadcast %cst_37 : f32 to vector<2x128xf32>
    %86 = arith.maximumf %84, %85 : vector<2x128xf32>
    %cst_38 = arith.constant dense<0.000000e+00> : vector<12x128xf32>
    %87 = tpu.matmul %12, %86, %cst_38 {dimension_numbers = #tpu.dot_dimension_numbers<[1], [0], [0], [1], [0, 0, 1, 1], [], []>} : vector<12x2xf32>, vector<2x128xf32>, vector<12x128xf32> -> vector<12x128xf32>
    %88 = vector.extract_strided_slice %57 {offsets = [2, 0], sizes = [2, 216], strides = [1, 1]} : vector<12x216xf32> to vector<2x216xf32>
    %89 = vector.extract_strided_slice %88 {offsets = [0, 16], sizes = [2, 128], strides = [1, 1]} : vector<2x216xf32> to vector<2x128xf32>
    %cst_39 = arith.constant dense<0.000000e+00> : vector<2x128xf32>
    %90 = tpu.matmul %22, %89, %cst_39 {dimension_numbers = #tpu.dot_dimension_numbers<[1], [0], [0], [1], [0, 0, 1, 1], [], []>} : vector<2x2xf32>, vector<2x128xf32>, vector<2x128xf32> -> vector<2x128xf32>
    %91 = vector.broadcast %25 : vector<2x1xf32> to vector<2x128xf32>
    %92 = arith.addf %91, %90 : vector<2x128xf32>
    %93 = vector.extract_strided_slice %88 {offsets = [0, 194], sizes = [2, 16], strides = [1, 1]} : vector<2x216xf32> to vector<2x16xf32>
    %cst_40 = arith.constant dense<0.000000e+00> : vector<2x16xf32>
    %94 = tpu.matmul %22, %93, %cst_40 {dimension_numbers = #tpu.dot_dimension_numbers<[1], [0], [0], [1], [0, 0, 1, 1], [], []>} : vector<2x2xf32>, vector<2x16xf32>, vector<2x16xf32> -> vector<2x16xf32>
    %95 = vector.broadcast %25 : vector<2x1xf32> to vector<2x16xf32>
    %96 = arith.addf %95, %94 : vector<2x16xf32>
    %97 = vector.extract_strided_slice %88 {offsets = [0, 32], sizes = [2, 128], strides = [1, 1]} : vector<2x216xf32> to vector<2x128xf32>
    %cst_41 = arith.constant dense<0.000000e+00> : vector<2x128xf32>
    %98 = tpu.matmul %23, %97, %cst_41 {dimension_numbers = #tpu.dot_dimension_numbers<[1], [0], [0], [1], [0, 0, 1, 1], [], []>} : vector<2x2xf32>, vector<2x128xf32>, vector<2x128xf32> -> vector<2x128xf32>
    %99 = arith.addf %92, %98 : vector<2x128xf32>
    %100 = vector.extract_strided_slice %88 {offsets = [0, 196], sizes = [2, 16], strides = [1, 1]} : vector<2x216xf32> to vector<2x16xf32>
    %cst_42 = arith.constant dense<0.000000e+00> : vector<2x16xf32>
    %101 = tpu.matmul %23, %100, %cst_42 {dimension_numbers = #tpu.dot_dimension_numbers<[1], [0], [0], [1], [0, 0, 1, 1], [], []>} : vector<2x2xf32>, vector<2x16xf32>, vector<2x16xf32> -> vector<2x16xf32>
    %102 = arith.addf %96, %101 : vector<2x16xf32>
    %103 = vector.extract_strided_slice %88 {offsets = [0, 48], sizes = [2, 128], strides = [1, 1]} : vector<2x216xf32> to vector<2x128xf32>
    %cst_43 = arith.constant dense<0.000000e+00> : vector<2x128xf32>
    %104 = tpu.matmul %24, %103, %cst_43 {dimension_numbers = #tpu.dot_dimension_numbers<[1], [0], [0], [1], [0, 0, 1, 1], [], []>} : vector<2x2xf32>, vector<2x128xf32>, vector<2x128xf32> -> vector<2x128xf32>
    %105 = arith.addf %99, %104 : vector<2x128xf32>
    %106 = vector.extract_strided_slice %88 {offsets = [0, 198], sizes = [2, 16], strides = [1, 1]} : vector<2x216xf32> to vector<2x16xf32>
    %cst_44 = arith.constant dense<0.000000e+00> : vector<2x16xf32>
    %107 = tpu.matmul %24, %106, %cst_44 {dimension_numbers = #tpu.dot_dimension_numbers<[1], [0], [0], [1], [0, 0, 1, 1], [], []>} : vector<2x2xf32>, vector<2x16xf32>, vector<2x16xf32> -> vector<2x16xf32>
    %108 = arith.addf %102, %107 : vector<2x16xf32>
    %cst_45 = arith.constant dense<0.000000e+00> : vector<2x128xf32>
    %109 = tpu.matmul %108, %5, %cst_45 {dimension_numbers = #tpu.dot_dimension_numbers<[1], [0], [0], [1], [0, 0, 1, 1], [], []>} : vector<2x16xf32>, vector<16x128xf32>, vector<2x128xf32> -> vector<2x128xf32>
    %110 = arith.addf %105, %109 : vector<2x128xf32>
    %111 = vector.broadcast %18 : vector<2x1xf32> to vector<2x128xf32>
    %112 = arith.mulf %110, %111 : vector<2x128xf32>
    %113 = vector.broadcast %19 : vector<2x1xf32> to vector<2x128xf32>
    %114 = arith.addf %112, %113 : vector<2x128xf32>
    %cst_46 = arith.constant 0.000000e+00 : f32
    %115 = vector.broadcast %cst_46 : f32 to vector<2x128xf32>
    %116 = arith.maximumf %114, %115 : vector<2x128xf32>
    %cst_47 = arith.constant dense<0.000000e+00> : vector<12x128xf32>
    %117 = tpu.matmul %20, %116, %cst_47 {dimension_numbers = #tpu.dot_dimension_numbers<[1], [0], [0], [1], [0, 0, 1, 1], [], []>} : vector<12x2xf32>, vector<2x128xf32>, vector<12x128xf32> -> vector<12x128xf32>
    %118 = arith.addf %87, %117 : vector<12x128xf32>
    %119 = vector.extract_strided_slice %57 {offsets = [4, 0], sizes = [2, 216], strides = [1, 1]} : vector<12x216xf32> to vector<2x216xf32>
    %120 = vector.extract_strided_slice %119 {offsets = [0, 8], sizes = [2, 128], strides = [1, 1]} : vector<2x216xf32> to vector<2x128xf32>
    %cst_48 = arith.constant dense<0.000000e+00> : vector<2x128xf32>
    %121 = tpu.matmul %30, %120, %cst_48 {dimension_numbers = #tpu.dot_dimension_numbers<[1], [0], [0], [1], [0, 0, 1, 1], [], []>} : vector<2x2xf32>, vector<2x128xf32>, vector<2x128xf32> -> vector<2x128xf32>
    %122 = vector.broadcast %33 : vector<2x1xf32> to vector<2x128xf32>
    %123 = arith.addf %122, %121 : vector<2x128xf32>
    %124 = vector.extract_strided_slice %119 {offsets = [0, 193], sizes = [2, 16], strides = [1, 1]} : vector<2x216xf32> to vector<2x16xf32>
    %cst_49 = arith.constant dense<0.000000e+00> : vector<2x16xf32>
    %125 = tpu.matmul %30, %124, %cst_49 {dimension_numbers = #tpu.dot_dimension_numbers<[1], [0], [0], [1], [0, 0, 1, 1], [], []>} : vector<2x2xf32>, vector<2x16xf32>, vector<2x16xf32> -> vector<2x16xf32>
    %126 = vector.broadcast %33 : vector<2x1xf32> to vector<2x16xf32>
    %127 = arith.addf %126, %125 : vector<2x16xf32>
    %128 = vector.extract_strided_slice %119 {offsets = [0, 32], sizes = [2, 128], strides = [1, 1]} : vector<2x216xf32> to vector<2x128xf32>
    %cst_50 = arith.constant dense<0.000000e+00> : vector<2x128xf32>
    %129 = tpu.matmul %31, %128, %cst_50 {dimension_numbers = #tpu.dot_dimension_numbers<[1], [0], [0], [1], [0, 0, 1, 1], [], []>} : vector<2x2xf32>, vector<2x128xf32>, vector<2x128xf32> -> vector<2x128xf32>
    %130 = arith.addf %123, %129 : vector<2x128xf32>
    %131 = vector.extract_strided_slice %119 {offsets = [0, 196], sizes = [2, 16], strides = [1, 1]} : vector<2x216xf32> to vector<2x16xf32>
    %cst_51 = arith.constant dense<0.000000e+00> : vector<2x16xf32>
    %132 = tpu.matmul %31, %131, %cst_51 {dimension_numbers = #tpu.dot_dimension_numbers<[1], [0], [0], [1], [0, 0, 1, 1], [], []>} : vector<2x2xf32>, vector<2x16xf32>, vector<2x16xf32> -> vector<2x16xf32>
    %133 = arith.addf %127, %132 : vector<2x16xf32>
    %134 = vector.extract_strided_slice %119 {offsets = [0, 56], sizes = [2, 128], strides = [1, 1]} : vector<2x216xf32> to vector<2x128xf32>
    %cst_52 = arith.constant dense<0.000000e+00> : vector<2x128xf32>
    %135 = tpu.matmul %32, %134, %cst_52 {dimension_numbers = #tpu.dot_dimension_numbers<[1], [0], [0], [1], [0, 0, 1, 1], [], []>} : vector<2x2xf32>, vector<2x128xf32>, vector<2x128xf32> -> vector<2x128xf32>
    %136 = arith.addf %130, %135 : vector<2x128xf32>
    %137 = vector.extract_strided_slice %119 {offsets = [0, 199], sizes = [2, 16], strides = [1, 1]} : vector<2x216xf32> to vector<2x16xf32>
    %cst_53 = arith.constant dense<0.000000e+00> : vector<2x16xf32>
    %138 = tpu.matmul %32, %137, %cst_53 {dimension_numbers = #tpu.dot_dimension_numbers<[1], [0], [0], [1], [0, 0, 1, 1], [], []>} : vector<2x2xf32>, vector<2x16xf32>, vector<2x16xf32> -> vector<2x16xf32>
    %139 = arith.addf %133, %138 : vector<2x16xf32>
    %cst_54 = arith.constant dense<0.000000e+00> : vector<2x128xf32>
    %140 = tpu.matmul %139, %5, %cst_54 {dimension_numbers = #tpu.dot_dimension_numbers<[1], [0], [0], [1], [0, 0, 1, 1], [], []>} : vector<2x16xf32>, vector<16x128xf32>, vector<2x128xf32> -> vector<2x128xf32>
    %141 = arith.addf %136, %140 : vector<2x128xf32>
    %142 = vector.broadcast %26 : vector<2x1xf32> to vector<2x128xf32>
    %143 = arith.mulf %141, %142 : vector<2x128xf32>
    %144 = vector.broadcast %27 : vector<2x1xf32> to vector<2x128xf32>
    %145 = arith.addf %143, %144 : vector<2x128xf32>
    %cst_55 = arith.constant 0.000000e+00 : f32
    %146 = vector.broadcast %cst_55 : f32 to vector<2x128xf32>
    %147 = arith.maximumf %145, %146 : vector<2x128xf32>
    %cst_56 = arith.constant dense<0.000000e+00> : vector<12x128xf32>
    %148 = tpu.matmul %28, %147, %cst_56 {dimension_numbers = #tpu.dot_dimension_numbers<[1], [0], [0], [1], [0, 0, 1, 1], [], []>} : vector<12x2xf32>, vector<2x128xf32>, vector<12x128xf32> -> vector<12x128xf32>
    %149 = arith.addf %118, %148 : vector<12x128xf32>
    %150 = vector.extract_strided_slice %57 {offsets = [6, 0], sizes = [2, 216], strides = [1, 1]} : vector<12x216xf32> to vector<2x216xf32>
    %151 = vector.extract_strided_slice %150 {offsets = [0, 0], sizes = [2, 128], strides = [1, 1]} : vector<2x216xf32> to vector<2x128xf32>
    %cst_57 = arith.constant dense<0.000000e+00> : vector<2x128xf32>
    %152 = tpu.matmul %38, %151, %cst_57 {dimension_numbers = #tpu.dot_dimension_numbers<[1], [0], [0], [1], [0, 0, 1, 1], [], []>} : vector<2x2xf32>, vector<2x128xf32>, vector<2x128xf32> -> vector<2x128xf32>
    %153 = vector.broadcast %41 : vector<2x1xf32> to vector<2x128xf32>
    %154 = arith.addf %153, %152 : vector<2x128xf32>
    %155 = vector.extract_strided_slice %150 {offsets = [0, 192], sizes = [2, 16], strides = [1, 1]} : vector<2x216xf32> to vector<2x16xf32>
    %cst_58 = arith.constant dense<0.000000e+00> : vector<2x16xf32>
    %156 = tpu.matmul %38, %155, %cst_58 {dimension_numbers = #tpu.dot_dimension_numbers<[1], [0], [0], [1], [0, 0, 1, 1], [], []>} : vector<2x2xf32>, vector<2x16xf32>, vector<2x16xf32> -> vector<2x16xf32>
    %157 = vector.broadcast %41 : vector<2x1xf32> to vector<2x16xf32>
    %158 = arith.addf %157, %156 : vector<2x16xf32>
    %159 = vector.extract_strided_slice %150 {offsets = [0, 32], sizes = [2, 128], strides = [1, 1]} : vector<2x216xf32> to vector<2x128xf32>
    %cst_59 = arith.constant dense<0.000000e+00> : vector<2x128xf32>
    %160 = tpu.matmul %39, %159, %cst_59 {dimension_numbers = #tpu.dot_dimension_numbers<[1], [0], [0], [1], [0, 0, 1, 1], [], []>} : vector<2x2xf32>, vector<2x128xf32>, vector<2x128xf32> -> vector<2x128xf32>
    %161 = arith.addf %154, %160 : vector<2x128xf32>
    %162 = vector.extract_strided_slice %150 {offsets = [0, 196], sizes = [2, 16], strides = [1, 1]} : vector<2x216xf32> to vector<2x16xf32>
    %cst_60 = arith.constant dense<0.000000e+00> : vector<2x16xf32>
    %163 = tpu.matmul %39, %162, %cst_60 {dimension_numbers = #tpu.dot_dimension_numbers<[1], [0], [0], [1], [0, 0, 1, 1], [], []>} : vector<2x2xf32>, vector<2x16xf32>, vector<2x16xf32> -> vector<2x16xf32>
    %164 = arith.addf %158, %163 : vector<2x16xf32>
    %165 = vector.extract_strided_slice %150 {offsets = [0, 64], sizes = [2, 128], strides = [1, 1]} : vector<2x216xf32> to vector<2x128xf32>
    %cst_61 = arith.constant dense<0.000000e+00> : vector<2x128xf32>
    %166 = tpu.matmul %40, %165, %cst_61 {dimension_numbers = #tpu.dot_dimension_numbers<[1], [0], [0], [1], [0, 0, 1, 1], [], []>} : vector<2x2xf32>, vector<2x128xf32>, vector<2x128xf32> -> vector<2x128xf32>
    %167 = arith.addf %161, %166 : vector<2x128xf32>
    %168 = vector.extract_strided_slice %150 {offsets = [0, 200], sizes = [2, 16], strides = [1, 1]} : vector<2x216xf32> to vector<2x16xf32>
    %cst_62 = arith.constant dense<0.000000e+00> : vector<2x16xf32>
    %169 = tpu.matmul %40, %168, %cst_62 {dimension_numbers = #tpu.dot_dimension_numbers<[1], [0], [0], [1], [0, 0, 1, 1], [], []>} : vector<2x2xf32>, vector<2x16xf32>, vector<2x16xf32> -> vector<2x16xf32>
    %170 = arith.addf %164, %169 : vector<2x16xf32>
    %cst_63 = arith.constant dense<0.000000e+00> : vector<2x128xf32>
    %171 = tpu.matmul %170, %5, %cst_63 {dimension_numbers = #tpu.dot_dimension_numbers<[1], [0], [0], [1], [0, 0, 1, 1], [], []>} : vector<2x16xf32>, vector<16x128xf32>, vector<2x128xf32> -> vector<2x128xf32>
    %172 = arith.addf %167, %171 : vector<2x128xf32>
    %173 = vector.broadcast %34 : vector<2x1xf32> to vector<2x128xf32>
    %174 = arith.mulf %172, %173 : vector<2x128xf32>
    %175 = vector.broadcast %35 : vector<2x1xf32> to vector<2x128xf32>
    %176 = arith.addf %174, %175 : vector<2x128xf32>
    %cst_64 = arith.constant 0.000000e+00 : f32
    %177 = vector.broadcast %cst_64 : f32 to vector<2x128xf32>
    %178 = arith.maximumf %176, %177 : vector<2x128xf32>
    %cst_65 = arith.constant dense<0.000000e+00> : vector<12x128xf32>
    %179 = tpu.matmul %36, %178, %cst_65 {dimension_numbers = #tpu.dot_dimension_numbers<[1], [0], [0], [1], [0, 0, 1, 1], [], []>} : vector<12x2xf32>, vector<2x128xf32>, vector<12x128xf32> -> vector<12x128xf32>
    %180 = arith.addf %149, %179 : vector<12x128xf32>
    %181 = vector.extract_strided_slice %57 {offsets = [8, 0], sizes = [2, 216], strides = [1, 1]} : vector<12x216xf32> to vector<2x216xf32>
    %182 = vector.extract_strided_slice %181 {offsets = [0, 24], sizes = [2, 128], strides = [1, 1]} : vector<2x216xf32> to vector<2x128xf32>
    %183 = vector.extract_strided_slice %181 {offsets = [0, 32], sizes = [2, 128], strides = [1, 1]} : vector<2x216xf32> to vector<2x128xf32>
    %184 = arith.maximumf %182, %183 : vector<2x128xf32>
    %185 = vector.extract_strided_slice %181 {offsets = [0, 40], sizes = [2, 128], strides = [1, 1]} : vector<2x216xf32> to vector<2x128xf32>
    %186 = arith.maximumf %184, %185 : vector<2x128xf32>
    %187 = vector.extract_strided_slice %181 {offsets = [0, 195], sizes = [2, 16], strides = [1, 1]} : vector<2x216xf32> to vector<2x16xf32>
    %188 = vector.extract_strided_slice %181 {offsets = [0, 196], sizes = [2, 16], strides = [1, 1]} : vector<2x216xf32> to vector<2x16xf32>
    %189 = arith.maximumf %187, %188 : vector<2x16xf32>
    %190 = vector.extract_strided_slice %181 {offsets = [0, 197], sizes = [2, 16], strides = [1, 1]} : vector<2x216xf32> to vector<2x16xf32>
    %191 = arith.maximumf %189, %190 : vector<2x16xf32>
    %cst_66 = arith.constant dense<0.000000e+00> : vector<2x128xf32>
    %192 = tpu.matmul %191, %5, %cst_66 {dimension_numbers = #tpu.dot_dimension_numbers<[1], [0], [0], [1], [0, 0, 1, 1], [], []>} : vector<2x16xf32>, vector<16x128xf32>, vector<2x128xf32> -> vector<2x128xf32>
    %193 = arith.addf %186, %192 : vector<2x128xf32>
    %194 = vector.broadcast %42 : vector<2x1xf32> to vector<2x128xf32>
    %195 = arith.mulf %193, %194 : vector<2x128xf32>
    %196 = vector.broadcast %43 : vector<2x1xf32> to vector<2x128xf32>
    %197 = arith.addf %195, %196 : vector<2x128xf32>
    %cst_67 = arith.constant 0.000000e+00 : f32
    %198 = vector.broadcast %cst_67 : f32 to vector<2x128xf32>
    %199 = arith.maximumf %197, %198 : vector<2x128xf32>
    %cst_68 = arith.constant dense<0.000000e+00> : vector<12x128xf32>
    %200 = tpu.matmul %44, %199, %cst_68 {dimension_numbers = #tpu.dot_dimension_numbers<[1], [0], [0], [1], [0, 0, 1, 1], [], []>} : vector<12x2xf32>, vector<2x128xf32>, vector<12x128xf32> -> vector<12x128xf32>
    %201 = arith.addf %180, %200 : vector<12x128xf32>
    %202 = vector.extract_strided_slice %57 {offsets = [10, 0], sizes = [2, 216], strides = [1, 1]} : vector<12x216xf32> to vector<2x216xf32>
    %203 = vector.extract_strided_slice %202 {offsets = [0, 32], sizes = [2, 128], strides = [1, 1]} : vector<2x216xf32> to vector<2x128xf32>
    %204 = vector.extract_strided_slice %202 {offsets = [0, 196], sizes = [2, 16], strides = [1, 1]} : vector<2x216xf32> to vector<2x16xf32>
    %cst_69 = arith.constant dense<0.000000e+00> : vector<2x128xf32>
    %205 = tpu.matmul %204, %5, %cst_69 {dimension_numbers = #tpu.dot_dimension_numbers<[1], [0], [0], [1], [0, 0, 1, 1], [], []>} : vector<2x16xf32>, vector<16x128xf32>, vector<2x128xf32> -> vector<2x128xf32>
    %206 = arith.addf %203, %205 : vector<2x128xf32>
    %207 = vector.broadcast %45 : vector<2x1xf32> to vector<2x128xf32>
    %208 = arith.mulf %206, %207 : vector<2x128xf32>
    %209 = vector.broadcast %46 : vector<2x1xf32> to vector<2x128xf32>
    %210 = arith.addf %208, %209 : vector<2x128xf32>
    %cst_70 = arith.constant 0.000000e+00 : f32
    %211 = vector.broadcast %cst_70 : f32 to vector<2x128xf32>
    %212 = arith.maximumf %210, %211 : vector<2x128xf32>
    %cst_71 = arith.constant dense<0.000000e+00> : vector<12x128xf32>
    %213 = tpu.matmul %47, %212, %cst_71 {dimension_numbers = #tpu.dot_dimension_numbers<[1], [0], [0], [1], [0, 0, 1, 1], [], []>} : vector<12x2xf32>, vector<2x128xf32>, vector<12x128xf32> -> vector<12x128xf32>
    %214 = arith.addf %201, %213 : vector<12x128xf32>
    %215 = vector.broadcast %9 : vector<12x1xf32> to vector<12x128xf32>
    %216 = arith.addf %214, %215 : vector<12x128xf32>
    %c0_72 = arith.constant 0 : index
    %c0_73 = arith.constant 0 : index
    %c0_74 = arith.constant 0 : index
    %217 = vector.load %arg16[%c0_72, %c0_73, %c0_74] : memref<2x12x128xf32, #tpu.memory_space<vmem>>, vector<1x12x128xf32>
    %218 = vector.shape_cast %217 : vector<1x12x128xf32> to vector<12x128xf32>
    %219 = vector.shape_cast %216 : vector<12x128xf32> to vector<1x12x128xf32>
    tpu.vector_store %arg16[%c0_72, %c0_73, %c0_74], %219 {strides = array<i32>} : memref<2x12x128xf32, #tpu.memory_space<vmem>>, vector<1x12x128xf32>,
    %c1 = arith.constant 1 : index
    %c0_75 = arith.constant 0 : index
    %c0_76 = arith.constant 0 : index
    %220 = vector.load %arg1[%c1, %c0_75, %c0_76] : memref<2x4x216xf32, #tpu.memory_space<vmem>>, vector<1x4x216xf32>
    %221 = vector.shape_cast %220 : vector<1x4x216xf32> to vector<4x216xf32>
    %cst_77 = arith.constant dense<0.000000e+00> : vector<12x216xf32>
    %222 = tpu.matmul %0, %221, %cst_77 {dimension_numbers = #tpu.dot_dimension_numbers<[1], [0], [0], [1], [0, 0, 1, 1], [], []>} : vector<12x4xf32>, vector<4x216xf32>, vector<12x216xf32> -> vector<12x216xf32>
    %223 = vector.broadcast %1 : vector<12x1xf32> to vector<12x216xf32>
    %224 = arith.addf %222, %223 : vector<12x216xf32>
    %225 = vector.broadcast %2 : vector<12x1xf32> to vector<12x216xf32>
    %226 = arith.mulf %224, %225 : vector<12x216xf32>
    %227 = arith.maximumf %224, %226 : vector<12x216xf32>
    %228 = vector.broadcast %3 : vector<1x216xf32> to vector<12x216xf32>
    %229 = arith.mulf %227, %228 : vector<12x216xf32>
    %230 = vector.extract_strided_slice %229 {offsets = [0, 0], sizes = [2, 216], strides = [1, 1]} : vector<12x216xf32> to vector<2x216xf32>
    %231 = vector.extract_strided_slice %230 {offsets = [0, 24], sizes = [2, 128], strides = [1, 1]} : vector<2x216xf32> to vector<2x128xf32>
    %cst_78 = arith.constant dense<0.000000e+00> : vector<2x128xf32>
    %232 = tpu.matmul %14, %231, %cst_78 {dimension_numbers = #tpu.dot_dimension_numbers<[1], [0], [0], [1], [0, 0, 1, 1], [], []>} : vector<2x2xf32>, vector<2x128xf32>, vector<2x128xf32> -> vector<2x128xf32>
    %233 = vector.broadcast %17 : vector<2x1xf32> to vector<2x128xf32>
    %234 = arith.addf %233, %232 : vector<2x128xf32>
    %235 = vector.extract_strided_slice %230 {offsets = [0, 195], sizes = [2, 16], strides = [1, 1]} : vector<2x216xf32> to vector<2x16xf32>
    %cst_79 = arith.constant dense<0.000000e+00> : vector<2x16xf32>
    %236 = tpu.matmul %14, %235, %cst_79 {dimension_numbers = #tpu.dot_dimension_numbers<[1], [0], [0], [1], [0, 0, 1, 1], [], []>} : vector<2x2xf32>, vector<2x16xf32>, vector<2x16xf32> -> vector<2x16xf32>
    %237 = vector.broadcast %17 : vector<2x1xf32> to vector<2x16xf32>
    %238 = arith.addf %237, %236 : vector<2x16xf32>
    %239 = vector.extract_strided_slice %230 {offsets = [0, 32], sizes = [2, 128], strides = [1, 1]} : vector<2x216xf32> to vector<2x128xf32>
    %cst_80 = arith.constant dense<0.000000e+00> : vector<2x128xf32>
    %240 = tpu.matmul %15, %239, %cst_80 {dimension_numbers = #tpu.dot_dimension_numbers<[1], [0], [0], [1], [0, 0, 1, 1], [], []>} : vector<2x2xf32>, vector<2x128xf32>, vector<2x128xf32> -> vector<2x128xf32>
    %241 = arith.addf %234, %240 : vector<2x128xf32>
    %242 = vector.extract_strided_slice %230 {offsets = [0, 196], sizes = [2, 16], strides = [1, 1]} : vector<2x216xf32> to vector<2x16xf32>
    %cst_81 = arith.constant dense<0.000000e+00> : vector<2x16xf32>
    %243 = tpu.matmul %15, %242, %cst_81 {dimension_numbers = #tpu.dot_dimension_numbers<[1], [0], [0], [1], [0, 0, 1, 1], [], []>} : vector<2x2xf32>, vector<2x16xf32>, vector<2x16xf32> -> vector<2x16xf32>
    %244 = arith.addf %238, %243 : vector<2x16xf32>
    %245 = vector.extract_strided_slice %230 {offsets = [0, 40], sizes = [2, 128], strides = [1, 1]} : vector<2x216xf32> to vector<2x128xf32>
    %cst_82 = arith.constant dense<0.000000e+00> : vector<2x128xf32>
    %246 = tpu.matmul %16, %245, %cst_82 {dimension_numbers = #tpu.dot_dimension_numbers<[1], [0], [0], [1], [0, 0, 1, 1], [], []>} : vector<2x2xf32>, vector<2x128xf32>, vector<2x128xf32> -> vector<2x128xf32>
    %247 = arith.addf %241, %246 : vector<2x128xf32>
    %248 = vector.extract_strided_slice %230 {offsets = [0, 197], sizes = [2, 16], strides = [1, 1]} : vector<2x216xf32> to vector<2x16xf32>
    %cst_83 = arith.constant dense<0.000000e+00> : vector<2x16xf32>
    %249 = tpu.matmul %16, %248, %cst_83 {dimension_numbers = #tpu.dot_dimension_numbers<[1], [0], [0], [1], [0, 0, 1, 1], [], []>} : vector<2x2xf32>, vector<2x16xf32>, vector<2x16xf32> -> vector<2x16xf32>
    %250 = arith.addf %244, %249 : vector<2x16xf32>
    %cst_84 = arith.constant dense<0.000000e+00> : vector<2x128xf32>
    %251 = tpu.matmul %250, %5, %cst_84 {dimension_numbers = #tpu.dot_dimension_numbers<[1], [0], [0], [1], [0, 0, 1, 1], [], []>} : vector<2x16xf32>, vector<16x128xf32>, vector<2x128xf32> -> vector<2x128xf32>
    %252 = arith.addf %247, %251 : vector<2x128xf32>
    %253 = vector.broadcast %10 : vector<2x1xf32> to vector<2x128xf32>
    %254 = arith.mulf %252, %253 : vector<2x128xf32>
    %255 = vector.broadcast %11 : vector<2x1xf32> to vector<2x128xf32>
    %256 = arith.addf %254, %255 : vector<2x128xf32>
    %cst_85 = arith.constant 0.000000e+00 : f32
    %257 = vector.broadcast %cst_85 : f32 to vector<2x128xf32>
    %258 = arith.maximumf %256, %257 : vector<2x128xf32>
    %cst_86 = arith.constant dense<0.000000e+00> : vector<12x128xf32>
    %259 = tpu.matmul %12, %258, %cst_86 {dimension_numbers = #tpu.dot_dimension_numbers<[1], [0], [0], [1], [0, 0, 1, 1], [], []>} : vector<12x2xf32>, vector<2x128xf32>, vector<12x128xf32> -> vector<12x128xf32>
    %260 = vector.extract_strided_slice %229 {offsets = [2, 0], sizes = [2, 216], strides = [1, 1]} : vector<12x216xf32> to vector<2x216xf32>
    %261 = vector.extract_strided_slice %260 {offsets = [0, 16], sizes = [2, 128], strides = [1, 1]} : vector<2x216xf32> to vector<2x128xf32>
    %cst_87 = arith.constant dense<0.000000e+00> : vector<2x128xf32>
    %262 = tpu.matmul %22, %261, %cst_87 {dimension_numbers = #tpu.dot_dimension_numbers<[1], [0], [0], [1], [0, 0, 1, 1], [], []>} : vector<2x2xf32>, vector<2x128xf32>, vector<2x128xf32> -> vector<2x128xf32>
    %263 = vector.broadcast %25 : vector<2x1xf32> to vector<2x128xf32>
    %264 = arith.addf %263, %262 : vector<2x128xf32>
    %265 = vector.extract_strided_slice %260 {offsets = [0, 194], sizes = [2, 16], strides = [1, 1]} : vector<2x216xf32> to vector<2x16xf32>
    %cst_88 = arith.constant dense<0.000000e+00> : vector<2x16xf32>
    %266 = tpu.matmul %22, %265, %cst_88 {dimension_numbers = #tpu.dot_dimension_numbers<[1], [0], [0], [1], [0, 0, 1, 1], [], []>} : vector<2x2xf32>, vector<2x16xf32>, vector<2x16xf32> -> vector<2x16xf32>
    %267 = vector.broadcast %25 : vector<2x1xf32> to vector<2x16xf32>
    %268 = arith.addf %267, %266 : vector<2x16xf32>
    %269 = vector.extract_strided_slice %260 {offsets = [0, 32], sizes = [2, 128], strides = [1, 1]} : vector<2x216xf32> to vector<2x128xf32>
    %cst_89 = arith.constant dense<0.000000e+00> : vector<2x128xf32>
    %270 = tpu.matmul %23, %269, %cst_89 {dimension_numbers = #tpu.dot_dimension_numbers<[1], [0], [0], [1], [0, 0, 1, 1], [], []>} : vector<2x2xf32>, vector<2x128xf32>, vector<2x128xf32> -> vector<2x128xf32>
    %271 = arith.addf %264, %270 : vector<2x128xf32>
    %272 = vector.extract_strided_slice %260 {offsets = [0, 196], sizes = [2, 16], strides = [1, 1]} : vector<2x216xf32> to vector<2x16xf32>
    %cst_90 = arith.constant dense<0.000000e+00> : vector<2x16xf32>
    %273 = tpu.matmul %23, %272, %cst_90 {dimension_numbers = #tpu.dot_dimension_numbers<[1], [0], [0], [1], [0, 0, 1, 1], [], []>} : vector<2x2xf32>, vector<2x16xf32>, vector<2x16xf32> -> vector<2x16xf32>
    %274 = arith.addf %268, %273 : vector<2x16xf32>
    %275 = vector.extract_strided_slice %260 {offsets = [0, 48], sizes = [2, 128], strides = [1, 1]} : vector<2x216xf32> to vector<2x128xf32>
    %cst_91 = arith.constant dense<0.000000e+00> : vector<2x128xf32>
    %276 = tpu.matmul %24, %275, %cst_91 {dimension_numbers = #tpu.dot_dimension_numbers<[1], [0], [0], [1], [0, 0, 1, 1], [], []>} : vector<2x2xf32>, vector<2x128xf32>, vector<2x128xf32> -> vector<2x128xf32>
    %277 = arith.addf %271, %276 : vector<2x128xf32>
    %278 = vector.extract_strided_slice %260 {offsets = [0, 198], sizes = [2, 16], strides = [1, 1]} : vector<2x216xf32> to vector<2x16xf32>
    %cst_92 = arith.constant dense<0.000000e+00> : vector<2x16xf32>
    %279 = tpu.matmul %24, %278, %cst_92 {dimension_numbers = #tpu.dot_dimension_numbers<[1], [0], [0], [1], [0, 0, 1, 1], [], []>} : vector<2x2xf32>, vector<2x16xf32>, vector<2x16xf32> -> vector<2x16xf32>
    %280 = arith.addf %274, %279 : vector<2x16xf32>
    %cst_93 = arith.constant dense<0.000000e+00> : vector<2x128xf32>
    %281 = tpu.matmul %280, %5, %cst_93 {dimension_numbers = #tpu.dot_dimension_numbers<[1], [0], [0], [1], [0, 0, 1, 1], [], []>} : vector<2x16xf32>, vector<16x128xf32>, vector<2x128xf32> -> vector<2x128xf32>
    %282 = arith.addf %277, %281 : vector<2x128xf32>
    %283 = vector.broadcast %18 : vector<2x1xf32> to vector<2x128xf32>
    %284 = arith.mulf %282, %283 : vector<2x128xf32>
    %285 = vector.broadcast %19 : vector<2x1xf32> to vector<2x128xf32>
    %286 = arith.addf %284, %285 : vector<2x128xf32>
    %cst_94 = arith.constant 0.000000e+00 : f32
    %287 = vector.broadcast %cst_94 : f32 to vector<2x128xf32>
    %288 = arith.maximumf %286, %287 : vector<2x128xf32>
    %cst_95 = arith.constant dense<0.000000e+00> : vector<12x128xf32>
    %289 = tpu.matmul %20, %288, %cst_95 {dimension_numbers = #tpu.dot_dimension_numbers<[1], [0], [0], [1], [0, 0, 1, 1], [], []>} : vector<12x2xf32>, vector<2x128xf32>, vector<12x128xf32> -> vector<12x128xf32>
    %290 = arith.addf %259, %289 : vector<12x128xf32>
    %291 = vector.extract_strided_slice %229 {offsets = [4, 0], sizes = [2, 216], strides = [1, 1]} : vector<12x216xf32> to vector<2x216xf32>
    %292 = vector.extract_strided_slice %291 {offsets = [0, 8], sizes = [2, 128], strides = [1, 1]} : vector<2x216xf32> to vector<2x128xf32>
    %cst_96 = arith.constant dense<0.000000e+00> : vector<2x128xf32>
    %293 = tpu.matmul %30, %292, %cst_96 {dimension_numbers = #tpu.dot_dimension_numbers<[1], [0], [0], [1], [0, 0, 1, 1], [], []>} : vector<2x2xf32>, vector<2x128xf32>, vector<2x128xf32> -> vector<2x128xf32>
    %294 = vector.broadcast %33 : vector<2x1xf32> to vector<2x128xf32>
    %295 = arith.addf %294, %293 : vector<2x128xf32>
    %296 = vector.extract_strided_slice %291 {offsets = [0, 193], sizes = [2, 16], strides = [1, 1]} : vector<2x216xf32> to vector<2x16xf32>
    %cst_97 = arith.constant dense<0.000000e+00> : vector<2x16xf32>
    %297 = tpu.matmul %30, %296, %cst_97 {dimension_numbers = #tpu.dot_dimension_numbers<[1], [0], [0], [1], [0, 0, 1, 1], [], []>} : vector<2x2xf32>, vector<2x16xf32>, vector<2x16xf32> -> vector<2x16xf32>
    %298 = vector.broadcast %33 : vector<2x1xf32> to vector<2x16xf32>
    %299 = arith.addf %298, %297 : vector<2x16xf32>
    %300 = vector.extract_strided_slice %291 {offsets = [0, 32], sizes = [2, 128], strides = [1, 1]} : vector<2x216xf32> to vector<2x128xf32>
    %cst_98 = arith.constant dense<0.000000e+00> : vector<2x128xf32>
    %301 = tpu.matmul %31, %300, %cst_98 {dimension_numbers = #tpu.dot_dimension_numbers<[1], [0], [0], [1], [0, 0, 1, 1], [], []>} : vector<2x2xf32>, vector<2x128xf32>, vector<2x128xf32> -> vector<2x128xf32>
    %302 = arith.addf %295, %301 : vector<2x128xf32>
    %303 = vector.extract_strided_slice %291 {offsets = [0, 196], sizes = [2, 16], strides = [1, 1]} : vector<2x216xf32> to vector<2x16xf32>
    %cst_99 = arith.constant dense<0.000000e+00> : vector<2x16xf32>
    %304 = tpu.matmul %31, %303, %cst_99 {dimension_numbers = #tpu.dot_dimension_numbers<[1], [0], [0], [1], [0, 0, 1, 1], [], []>} : vector<2x2xf32>, vector<2x16xf32>, vector<2x16xf32> -> vector<2x16xf32>
    %305 = arith.addf %299, %304 : vector<2x16xf32>
    %306 = vector.extract_strided_slice %291 {offsets = [0, 56], sizes = [2, 128], strides = [1, 1]} : vector<2x216xf32> to vector<2x128xf32>
    %cst_100 = arith.constant dense<0.000000e+00> : vector<2x128xf32>
    %307 = tpu.matmul %32, %306, %cst_100 {dimension_numbers = #tpu.dot_dimension_numbers<[1], [0], [0], [1], [0, 0, 1, 1], [], []>} : vector<2x2xf32>, vector<2x128xf32>, vector<2x128xf32> -> vector<2x128xf32>
    %308 = arith.addf %302, %307 : vector<2x128xf32>
    %309 = vector.extract_strided_slice %291 {offsets = [0, 199], sizes = [2, 16], strides = [1, 1]} : vector<2x216xf32> to vector<2x16xf32>
    %cst_101 = arith.constant dense<0.000000e+00> : vector<2x16xf32>
    %310 = tpu.matmul %32, %309, %cst_101 {dimension_numbers = #tpu.dot_dimension_numbers<[1], [0], [0], [1], [0, 0, 1, 1], [], []>} : vector<2x2xf32>, vector<2x16xf32>, vector<2x16xf32> -> vector<2x16xf32>
    %311 = arith.addf %305, %310 : vector<2x16xf32>
    %cst_102 = arith.constant dense<0.000000e+00> : vector<2x128xf32>
    %312 = tpu.matmul %311, %5, %cst_102 {dimension_numbers = #tpu.dot_dimension_numbers<[1], [0], [0], [1], [0, 0, 1, 1], [], []>} : vector<2x16xf32>, vector<16x128xf32>, vector<2x128xf32> -> vector<2x128xf32>
    %313 = arith.addf %308, %312 : vector<2x128xf32>
    %314 = vector.broadcast %26 : vector<2x1xf32> to vector<2x128xf32>
    %315 = arith.mulf %313, %314 : vector<2x128xf32>
    %316 = vector.broadcast %27 : vector<2x1xf32> to vector<2x128xf32>
    %317 = arith.addf %315, %316 : vector<2x128xf32>
    %cst_103 = arith.constant 0.000000e+00 : f32
    %318 = vector.broadcast %cst_103 : f32 to vector<2x128xf32>
    %319 = arith.maximumf %317, %318 : vector<2x128xf32>
    %cst_104 = arith.constant dense<0.000000e+00> : vector<12x128xf32>
    %320 = tpu.matmul %28, %319, %cst_104 {dimension_numbers = #tpu.dot_dimension_numbers<[1], [0], [0], [1], [0, 0, 1, 1], [], []>} : vector<12x2xf32>, vector<2x128xf32>, vector<12x128xf32> -> vector<12x128xf32>
    %321 = arith.addf %290, %320 : vector<12x128xf32>
    %322 = vector.extract_strided_slice %229 {offsets = [6, 0], sizes = [2, 216], strides = [1, 1]} : vector<12x216xf32> to vector<2x216xf32>
    %323 = vector.extract_strided_slice %322 {offsets = [0, 0], sizes = [2, 128], strides = [1, 1]} : vector<2x216xf32> to vector<2x128xf32>
    %cst_105 = arith.constant dense<0.000000e+00> : vector<2x128xf32>
    %324 = tpu.matmul %38, %323, %cst_105 {dimension_numbers = #tpu.dot_dimension_numbers<[1], [0], [0], [1], [0, 0, 1, 1], [], []>} : vector<2x2xf32>, vector<2x128xf32>, vector<2x128xf32> -> vector<2x128xf32>
    %325 = vector.broadcast %41 : vector<2x1xf32> to vector<2x128xf32>
    %326 = arith.addf %325, %324 : vector<2x128xf32>
    %327 = vector.extract_strided_slice %322 {offsets = [0, 192], sizes = [2, 16], strides = [1, 1]} : vector<2x216xf32> to vector<2x16xf32>
    %cst_106 = arith.constant dense<0.000000e+00> : vector<2x16xf32>
    %328 = tpu.matmul %38, %327, %cst_106 {dimension_numbers = #tpu.dot_dimension_numbers<[1], [0], [0], [1], [0, 0, 1, 1], [], []>} : vector<2x2xf32>, vector<2x16xf32>, vector<2x16xf32> -> vector<2x16xf32>
    %329 = vector.broadcast %41 : vector<2x1xf32> to vector<2x16xf32>
    %330 = arith.addf %329, %328 : vector<2x16xf32>
    %331 = vector.extract_strided_slice %322 {offsets = [0, 32], sizes = [2, 128], strides = [1, 1]} : vector<2x216xf32> to vector<2x128xf32>
    %cst_107 = arith.constant dense<0.000000e+00> : vector<2x128xf32>
    %332 = tpu.matmul %39, %331, %cst_107 {dimension_numbers = #tpu.dot_dimension_numbers<[1], [0], [0], [1], [0, 0, 1, 1], [], []>} : vector<2x2xf32>, vector<2x128xf32>, vector<2x128xf32> -> vector<2x128xf32>
    %333 = arith.addf %326, %332 : vector<2x128xf32>
    %334 = vector.extract_strided_slice %322 {offsets = [0, 196], sizes = [2, 16], strides = [1, 1]} : vector<2x216xf32> to vector<2x16xf32>
    %cst_108 = arith.constant dense<0.000000e+00> : vector<2x16xf32>
    %335 = tpu.matmul %39, %334, %cst_108 {dimension_numbers = #tpu.dot_dimension_numbers<[1], [0], [0], [1], [0, 0, 1, 1], [], []>} : vector<2x2xf32>, vector<2x16xf32>, vector<2x16xf32> -> vector<2x16xf32>
    %336 = arith.addf %330, %335 : vector<2x16xf32>
    %337 = vector.extract_strided_slice %322 {offsets = [0, 64], sizes = [2, 128], strides = [1, 1]} : vector<2x216xf32> to vector<2x128xf32>
    %cst_109 = arith.constant dense<0.000000e+00> : vector<2x128xf32>
    %338 = tpu.matmul %40, %337, %cst_109 {dimension_numbers = #tpu.dot_dimension_numbers<[1], [0], [0], [1], [0, 0, 1, 1], [], []>} : vector<2x2xf32>, vector<2x128xf32>, vector<2x128xf32> -> vector<2x128xf32>
    %339 = arith.addf %333, %338 : vector<2x128xf32>
    %340 = vector.extract_strided_slice %322 {offsets = [0, 200], sizes = [2, 16], strides = [1, 1]} : vector<2x216xf32> to vector<2x16xf32>
    %cst_110 = arith.constant dense<0.000000e+00> : vector<2x16xf32>
    %341 = tpu.matmul %40, %340, %cst_110 {dimension_numbers = #tpu.dot_dimension_numbers<[1], [0], [0], [1], [0, 0, 1, 1], [], []>} : vector<2x2xf32>, vector<2x16xf32>, vector<2x16xf32> -> vector<2x16xf32>
    %342 = arith.addf %336, %341 : vector<2x16xf32>
    %cst_111 = arith.constant dense<0.000000e+00> : vector<2x128xf32>
    %343 = tpu.matmul %342, %5, %cst_111 {dimension_numbers = #tpu.dot_dimension_numbers<[1], [0], [0], [1], [0, 0, 1, 1], [], []>} : vector<2x16xf32>, vector<16x128xf32>, vector<2x128xf32> -> vector<2x128xf32>
    %344 = arith.addf %339, %343 : vector<2x128xf32>
    %345 = vector.broadcast %34 : vector<2x1xf32> to vector<2x128xf32>
    %346 = arith.mulf %344, %345 : vector<2x128xf32>
    %347 = vector.broadcast %35 : vector<2x1xf32> to vector<2x128xf32>
    %348 = arith.addf %346, %347 : vector<2x128xf32>
    %cst_112 = arith.constant 0.000000e+00 : f32
    %349 = vector.broadcast %cst_112 : f32 to vector<2x128xf32>
    %350 = arith.maximumf %348, %349 : vector<2x128xf32>
    %cst_113 = arith.constant dense<0.000000e+00> : vector<12x128xf32>
    %351 = tpu.matmul %36, %350, %cst_113 {dimension_numbers = #tpu.dot_dimension_numbers<[1], [0], [0], [1], [0, 0, 1, 1], [], []>} : vector<12x2xf32>, vector<2x128xf32>, vector<12x128xf32> -> vector<12x128xf32>
    %352 = arith.addf %321, %351 : vector<12x128xf32>
    %353 = vector.extract_strided_slice %229 {offsets = [8, 0], sizes = [2, 216], strides = [1, 1]} : vector<12x216xf32> to vector<2x216xf32>
    %354 = vector.extract_strided_slice %353 {offsets = [0, 24], sizes = [2, 128], strides = [1, 1]} : vector<2x216xf32> to vector<2x128xf32>
    %355 = vector.extract_strided_slice %353 {offsets = [0, 32], sizes = [2, 128], strides = [1, 1]} : vector<2x216xf32> to vector<2x128xf32>
    %356 = arith.maximumf %354, %355 : vector<2x128xf32>
    %357 = vector.extract_strided_slice %353 {offsets = [0, 40], sizes = [2, 128], strides = [1, 1]} : vector<2x216xf32> to vector<2x128xf32>
    %358 = arith.maximumf %356, %357 : vector<2x128xf32>
    %359 = vector.extract_strided_slice %353 {offsets = [0, 195], sizes = [2, 16], strides = [1, 1]} : vector<2x216xf32> to vector<2x16xf32>
    %360 = vector.extract_strided_slice %353 {offsets = [0, 196], sizes = [2, 16], strides = [1, 1]} : vector<2x216xf32> to vector<2x16xf32>
    %361 = arith.maximumf %359, %360 : vector<2x16xf32>
    %362 = vector.extract_strided_slice %353 {offsets = [0, 197], sizes = [2, 16], strides = [1, 1]} : vector<2x216xf32> to vector<2x16xf32>
    %363 = arith.maximumf %361, %362 : vector<2x16xf32>
    %cst_114 = arith.constant dense<0.000000e+00> : vector<2x128xf32>
    %364 = tpu.matmul %363, %5, %cst_114 {dimension_numbers = #tpu.dot_dimension_numbers<[1], [0], [0], [1], [0, 0, 1, 1], [], []>} : vector<2x16xf32>, vector<16x128xf32>, vector<2x128xf32> -> vector<2x128xf32>
    %365 = arith.addf %358, %364 : vector<2x128xf32>
    %366 = vector.broadcast %42 : vector<2x1xf32> to vector<2x128xf32>
    %367 = arith.mulf %365, %366 : vector<2x128xf32>
    %368 = vector.broadcast %43 : vector<2x1xf32> to vector<2x128xf32>
    %369 = arith.addf %367, %368 : vector<2x128xf32>
    %cst_115 = arith.constant 0.000000e+00 : f32
    %370 = vector.broadcast %cst_115 : f32 to vector<2x128xf32>
    %371 = arith.maximumf %369, %370 : vector<2x128xf32>
    %cst_116 = arith.constant dense<0.000000e+00> : vector<12x128xf32>
    %372 = tpu.matmul %44, %371, %cst_116 {dimension_numbers = #tpu.dot_dimension_numbers<[1], [0], [0], [1], [0, 0, 1, 1], [], []>} : vector<12x2xf32>, vector<2x128xf32>, vector<12x128xf32> -> vector<12x128xf32>
    %373 = arith.addf %352, %372 : vector<12x128xf32>
    %374 = vector.extract_strided_slice %229 {offsets = [10, 0], sizes = [2, 216], strides = [1, 1]} : vector<12x216xf32> to vector<2x216xf32>
    %375 = vector.extract_strided_slice %374 {offsets = [0, 32], sizes = [2, 128], strides = [1, 1]} : vector<2x216xf32> to vector<2x128xf32>
    %376 = vector.extract_strided_slice %374 {offsets = [0, 196], sizes = [2, 16], strides = [1, 1]} : vector<2x216xf32> to vector<2x16xf32>
    %cst_117 = arith.constant dense<0.000000e+00> : vector<2x128xf32>
    %377 = tpu.matmul %376, %5, %cst_117 {dimension_numbers = #tpu.dot_dimension_numbers<[1], [0], [0], [1], [0, 0, 1, 1], [], []>} : vector<2x16xf32>, vector<16x128xf32>, vector<2x128xf32> -> vector<2x128xf32>
    %378 = arith.addf %375, %377 : vector<2x128xf32>
    %379 = vector.broadcast %45 : vector<2x1xf32> to vector<2x128xf32>
    %380 = arith.mulf %378, %379 : vector<2x128xf32>
    %381 = vector.broadcast %46 : vector<2x1xf32> to vector<2x128xf32>
    %382 = arith.addf %380, %381 : vector<2x128xf32>
    %cst_118 = arith.constant 0.000000e+00 : f32
    %383 = vector.broadcast %cst_118 : f32 to vector<2x128xf32>
    %384 = arith.maximumf %382, %383 : vector<2x128xf32>
    %cst_119 = arith.constant dense<0.000000e+00> : vector<12x128xf32>
    %385 = tpu.matmul %47, %384, %cst_119 {dimension_numbers = #tpu.dot_dimension_numbers<[1], [0], [0], [1], [0, 0, 1, 1], [], []>} : vector<12x2xf32>, vector<2x128xf32>, vector<12x128xf32> -> vector<12x128xf32>
    %386 = arith.addf %373, %385 : vector<12x128xf32>
    %387 = vector.broadcast %9 : vector<12x1xf32> to vector<12x128xf32>
    %388 = arith.addf %386, %387 : vector<12x128xf32>
    %c1_120 = arith.constant 1 : index
    %c0_121 = arith.constant 0 : index
    %c0_122 = arith.constant 0 : index
    %389 = vector.load %arg16[%c1_120, %c0_121, %c0_122] : memref<2x12x128xf32, #tpu.memory_space<vmem>>, vector<1x12x128xf32>
    %390 = vector.shape_cast %389 : vector<1x12x128xf32> to vector<12x128xf32>
    %391 = vector.shape_cast %388 : vector<12x128xf32> to vector<1x12x128xf32>
    tpu.vector_store %arg16[%c1_120, %c0_121, %c0_122], %391 {strides = array<i32>} : memref<2x12x128xf32, #tpu.memory_space<vmem>>, vector<1x12x128xf32>,
    return
  }
  func.func @transform_0(%arg0: i32) -> (i32, i32, i32) {
    %c0_i32 = arith.constant 0 : i32
    %c0_i32_0 = arith.constant 0 : i32
    %c0_i32_1 = arith.constant 0 : i32
    return %arg0, %c0_i32, %c0_i32_0 : i32, i32, i32
  }
  func.func @transform_1(%arg0: i32) -> (i32, i32) {
    %c0_i32 = arith.constant 0 : i32
    %c0_i32_0 = arith.constant 0 : i32
    %c0_i32_1 = arith.constant 0 : i32
    return %c0_i32, %c0_i32_0 : i32, i32
  }
  func.func @transform_2(%arg0: i32) -> (i32, i32) {
    %c0_i32 = arith.constant 0 : i32
    %c0_i32_0 = arith.constant 0 : i32
    %c0_i32_1 = arith.constant 0 : i32
    return %c0_i32, %c0_i32_0 : i32, i32
  }
  func.func @transform_3(%arg0: i32) -> (i32, i32) {
    %c0_i32 = arith.constant 0 : i32
    %c0_i32_0 = arith.constant 0 : i32
    %c0_i32_1 = arith.constant 0 : i32
    return %c0_i32, %c0_i32_0 : i32, i32
  }
  func.func @transform_4(%arg0: i32) -> (i32, i32) {
    %c0_i32 = arith.constant 0 : i32
    %c0_i32_0 = arith.constant 0 : i32
    %c0_i32_1 = arith.constant 0 : i32
    return %c0_i32, %c0_i32_0 : i32, i32
  }
  func.func @transform_5(%arg0: i32) -> (i32, i32) {
    %c0_i32 = arith.constant 0 : i32
    %c0_i32_0 = arith.constant 0 : i32
    %c0_i32_1 = arith.constant 0 : i32
    return %c0_i32, %c0_i32_0 : i32, i32
  }
  func.func @transform_6(%arg0: i32) -> (i32, i32) {
    %c0_i32 = arith.constant 0 : i32
    %c0_i32_0 = arith.constant 0 : i32
    %c0_i32_1 = arith.constant 0 : i32
    return %c0_i32, %c0_i32_0 : i32, i32
  }
  func.func @transform_7(%arg0: i32) -> (i32, i32) {
    %c0_i32 = arith.constant 0 : i32
    %c0_i32_0 = arith.constant 0 : i32
    %c0_i32_1 = arith.constant 0 : i32
    return %c0_i32, %c0_i32_0 : i32, i32
  }
  func.func @transform_8(%arg0: i32) -> (i32, i32) {
    %c0_i32 = arith.constant 0 : i32
    %c0_i32_0 = arith.constant 0 : i32
    %c0_i32_1 = arith.constant 0 : i32
    return %c0_i32, %c0_i32_0 : i32, i32
  }
  func.func @transform_9(%arg0: i32) -> (i32, i32) {
    %c0_i32 = arith.constant 0 : i32
    %c0_i32_0 = arith.constant 0 : i32
    %c0_i32_1 = arith.constant 0 : i32
    return %c0_i32, %c0_i32_0 : i32, i32
  }
  func.func @transform_10(%arg0: i32) -> (i32, i32) {
    %c0_i32 = arith.constant 0 : i32
    %c0_i32_0 = arith.constant 0 : i32
    %c0_i32_1 = arith.constant 0 : i32
    return %c0_i32, %c0_i32_0 : i32, i32
  }
  func.func @transform_11(%arg0: i32) -> (i32, i32) {
    %c0_i32 = arith.constant 0 : i32
    %c0_i32_0 = arith.constant 0 : i32
    %c0_i32_1 = arith.constant 0 : i32
    return %c0_i32, %c0_i32_0 : i32, i32
  }
  func.func @transform_12(%arg0: i32) -> (i32, i32) {
    %c0_i32 = arith.constant 0 : i32
    %c0_i32_0 = arith.constant 0 : i32
    %c0_i32_1 = arith.constant 0 : i32
    return %c0_i32, %c0_i32_0 : i32, i32
  }
  func.func @transform_13(%arg0: i32) -> (i32, i32) {
    %c0_i32 = arith.constant 0 : i32
    %c0_i32_0 = arith.constant 0 : i32
    %c0_i32_1 = arith.constant 0 : i32
    return %c0_i32, %c0_i32_0 : i32, i32
  }
  func.func @transform_14(%arg0: i32) -> (i32, i32) {
    %c0_i32 = arith.constant 0 : i32
    %c0_i32_0 = arith.constant 0 : i32
    %c0_i32_1 = arith.constant 0 : i32
    return %c0_i32, %c0_i32_0 : i32, i32
  }
  func.func @transform_15(%arg0: i32) -> (i32, i32, i32) {
    %c0_i32 = arith.constant 0 : i32
    %c0_i32_0 = arith.constant 0 : i32
    %c0_i32_1 = arith.constant 0 : i32
    return %arg0, %c0_i32, %c0_i32_0 : i32, i32, i32
  }
}

</mosaic_0001>

<bundles_post_ra>
// kernel: tpu_custom_call.1
= control target key start
LH: loop header
LB: loop body
LE: loop exit
PB: predicated region body
PF: predicated region fallthrough
CT: control target
= control target key end

     0   :  { %s3416_s18 = smov 0   ;;  %s4283_s0 = inlined_call_operand.vmem [shape: f32[4,4,216], index: 0, kind: input, shape index: {}]   ;;  %s4284_s1 = inlined_call_operand.vmem [shape: f32[12,4], index: 1, kind: input, shape index: {}]   ;;  %s4285_s2 = inlined_call_operand.vmem [shape: f32[12,1], index: 2, kind: input, shape index: {}]   ;;  %s4286_s3 = inlined_call_operand.vmem [shape: f32[12,1], index: 3, kind: input, shape index: {}]   ;;  %s4287_s4 = inlined_call_operand.vmem [shape: f32[1,216], index: 4, kind: input, shape index: {}]   ;;  %s4288_s5 = inlined_call_operand.vmem [shape: f32[2,6], index: 5, kind: input, shape index: {}]   ;;  %s4289_s6 = inlined_call_operand.vmem [shape: f32[2,6], index: 6, kind: input, shape index: {}]   ;;  %s4290_s7 = inlined_call_operand.vmem [shape: f32[2,6], index: 7, kind: input, shape index: {}]   ;;  %s4291_s8 = inlined_call_operand.vmem [shape: f32[2,6], index: 8, kind: input, shape index: {}]   ;;  %s4292_s9 = inlined_call_operand.vmem [shape: f32[12,1], index: 9, kind: input, shape index: {}]   ;;  %s4293_s10 = inlined_call_operand.vmem [shape: f32[16,128], index: 10, kind: input, shape index: {}]   ;;  %s4294_s11 = inlined_call_operand.vmem [shape: f32[12,1], index: 11, kind: input, shape index: {}]   ;;  %s4295_s12 = inlined_call_operand.vmem [shape: f32[12,1], index: 12, kind: input, shape index: {}]   ;;  %s4296_s13 = inlined_call_operand.vmem [shape: f32[12,12], index: 13, kind: input, shape index: {}]   ;;  %s4297_s14 = inlined_call_operand.vmem [shape: f32[12,1], index: 14, kind: input, shape index: {}]   ;;  %s4298_s15 = inlined_call_operand.vmem [shape: f32[4,12,128], index: 15, kind: output, shape index: {}]  }
   0x1 LB: > { %s3086_s19 = sadd.s32 4294967295, %s3310_s18   ;;  %p3090_p0 = scmp.ge.s32.totalorder %s3310_s18, 1  ;;  %s3310_s18 = sphi %s3416_s18, %s25_s18  }
   0x2   : > { %p439_p1 = scmp.lt.s32.totalorder %s3310_s18, 3 }
   0x4   : > { %p440_p2 = pnand %p3090_p0, %p439_p1 }
   0x5   : > { %s3091_s22 = sshll.u32 (!%p440_p2), %s3086_s19, 1  ;;  %s3313_s19 = smov (!%p440_p2), 126  }
   0x6   : > { %443 = sbr.rel (%p440_p2) target bundleno = 2426 (0x97a), region = 80  ;;  %p490_p3 = scmp.lt.s32.totalorder (!%p440_p2), %s3091_s22, 3 }
   0x7   : > { %s3314_s20 = smov (!%p440_p2), 124   ;;  %s3315_s24 = smov (!%p440_p2), 59  }
   0x8   : > { %s4315_s25 = smov (!%p440_p2), 61   ;;  %s4303_s27 = smov (!%p440_p2), 104  }
   0x9   : > { %s3319_s28 = smov (!%p440_p2), 60   ;;  %s4300_s29 = smov (!%p440_p2), 88  }
   0xa   : > { %s4302_s30 = smov (!%p440_p2), 58   ;;  %s4308_s16 = smov (!%p440_p2), 112  }
   0xb   : > { %v505_v0 = vld [vmem:[%s4285_s2] sm:$0xff]  ;;  %v3312_v1 = vmov 0   ;;  %s4331_s22 = smov (!%p490_p3, %s3091_s22), 3  ;;  %vm547_vm0 = vcmask 1043456   ;;  %vm540_vm1 = vcmask 31744   ;;  %s4306_s17 = smov 80  }
   0xc   : > { %3293 = vset.pattern.permute.xlu0 %v3312_v1  ;;  %3294 = vset.pattern.permute.xlu2 %v3312_v1  ;;  %s3258_s23 = sshll.u32 %s4331_s22, 3  ;;  %v507_v3 = vld [vmem:[%s4286_s3] sm:$0xff]  ;;  %s4305_s21 = smov 63   ;;  %v3518_v30 = vld [vmem:[%s4284_s1 + $0x8] sm:$0xf]  ;;  %vm637_vm2 = vcmask 1041408  }
   0xd   : > { %528 = vperm.xlu0 %3293, %v505_v0   ;;  %3295 = vset.pattern.permute.xlu1 %v3312_v1  ;;  %s494_s26 = scalar_lea.vmem %s4283_s0, %s3258_s23  ;;  %v3439_v5 = vld [vmem:[%s4284_s1] sm:$0xff]  ;;  %s4299_s23 = smov 62   ;;  %v3548_v35 = vld [vmem:[%s4296_s13 + $0x8] sm:$0xf]  ;;  %vm633_vm3 = vcmask 15360   ;;  %vm631_vm4 = vcmask 850944  }
   0xe   : > { %v525_v2 = vld [vmem:[%s494_s26] sm:$0xff]  ;;  %v3175_v4 = vld [vmem:[%s494_s26 + $0x8] sm:$0xff]  ;;  %s3317_s26 = smov 96   ;;  %vm697_vm5 = vcmask 785408   ;;  %vm755_vm6 = vcmask 719872   ;;  %vm851_vm7 = vcmask 916480  }
   0xf   : > { %537 = vst [vmem:[#allocation1] ss:$2 sm:$0xff] %v525_v2  ;;  %v3451_v8 = vld [vmem:[%s4288_s5] sm:$0x3]  ;;  %v508_v44 = vld [vmem:[%s4286_s3 + $0x8] sm:$0xf] }
  0x10   : > { %691 = vrot.lane.b32.xlu2 %v3451_v8, %s3313_s19  ;;  %v509_v10 = vld [vmem:[%s4287_s4] sm:$0x3]  ;;  %v506_v48 = vld [vmem:[%s4285_s2 + $0x8] sm:$0xf]  ;;  %vm979_vm8 = vcmask 654336   ;;  %vm1269_vm9 = vcmask 588800  }
  0x11   : > { %v3467_v17 = vperm.slane %v509_v10, 0  ;;  %v3470_v19 = vperm.slane %v509_v10, 1  ;;  %v510_v24 = vld [vmem:[%s4292_s9] sm:$0xff]  ;;  %v3615_v60 = vld [vmem:[%s4293_s10 + $0x8] sm:$0xff]  ;;  %vm1141_vm10 = vcmask 982016   ;;  %vm807_vm11 = vcmask 130048  }
  0x12   : > { %v3493_v26 = vld [vmem:[%s4289_s6] sm:$0x3]  ;;  %vm1521_vm12 = vcmask 523264  }
  0x13   : > { %v515_v29 = vld [vmem:[%s4295_s12] sm:$0xff] }
  0x14   : > { %v3527_v31 = vld [vmem:[%s4290_s7] sm:$0x3] }
  0x15   : > { %600 = vperm.xlu0 %3293, %v507_v3   ;;  %v513_v32 = vld [vmem:[%s4294_s11] sm:$0xff] }
  0x16   : > { %v538_v6 = vld.sshfl [vmem:[#allocation1] sm:$0xff pattern:$0x75316420]  ;;  %v539_v7 = vld.sshfl [vmem:[#allocation1 + $0x8] sm:$0xff pattern:$0x75316420] }
  0x17   : > { %3097 = vmatpush.msk.msra.mxu0 %vm547_vm0, %v538_v6  ;;  %3100 = vmatpush.msk.msra.mxu1 %vm547_vm0, %v539_v7  ;;  %1863 = vst [vmem:[#allocation1] ss:$2 sm:$0xff] %v3175_v4  ;;  %v3539_v34 = vld [vmem:[%s4296_s13] sm:$0xff] }
  0x18   : > { %3098 = vmatmul.msk.f32.vlgmr.msra.gmra.mxu0 %vm540_vm1, %v3439_v5  ;;  %3101 = vmatmul.msk.f32.vlgmr.msra.gmra.mxu1 %vm540_vm1, %v3439_v5  ;;  %v3575_v42 = vld [vmem:[%s4291_s8] sm:$0x3] }
  0x19   : > { %3260 = vmatpush.msk.msra.mxu3 %vm547_vm0, %v539_v7  ;;  %v3623_v61 = vld [vmem:[%s4293_s10] sm:$0xff] }
  0x1a   : > { %3102 = vmatmul.msk.f32.vlgmr.msra.gmra.mxu3 %vm540_vm1, %v3518_v30 }
  0x1d   : > { %749 = vrot.lane.b32.xlu0 %v3451_v8, %s3314_s20 }
  0x20   : > { %3099 = vmatmul.msk.f32.gmra.mxu0 %vm540_vm1, %v3518_v30 }
  0x6a   : > { %v3554_v36 = vpop.permute.xlu2 %691 }
  0x7f   : > { %v3457_v9 = vpop.permute.xlu0 %528 }
  0x87   : > { %v3464_v15 = vpop.permute.xlu0 %600 }
  0x8f   : > { %v3561_v39 = vpop.permute.xlu0 %749 }
  0x95   : > { %v569_v11 = vpop.f32.mrf.mxu0  ;;  %v592_v12 = vpop.f32.mrf.mxu1 }
  0x96   : > { %v570_v13 = vadd.f32 %v569_v11, %v3457_v9  ;;  %v593_v14 = vadd.f32 %v592_v12, %v3457_v9 }
  0x98   : > { %v608_v16 = vmul.f32 %v3464_v15, %v570_v13  ;;  %v609_v18 = vmul.f32 %v3464_v15, %v593_v14 }
  0x9a   : > { %v612_v20 = vmax.f32 %v570_v13, %v608_v16  ;;  %v613_v21 = vmax.f32 %v593_v14, %v609_v18 }
  0x9c   : > { %v3473_v22 = vmul.f32 %v3467_v17, %v612_v20  ;;  %v622_v23 = vmul.f32 %v3470_v19, %v613_v21 }
  0x9e   : > { %782 = vrot.lane.b32.xlu2 %v622_v23, %s3315_s24  ;;  %666 = vrot.lane.b32.xlu1 %v622_v23, %s4315_s25  ;;  %v846_v25 = vrot.slane %v622_v23, 2  ;;  %v845_v27 = vrot.slane %v3473_v22, 2  ;;  %v1136_v28 = vrot.slane %v622_v23, 4  ;;  %v1135_v33 = vrot.slane %v3473_v22, 4 }
  0x9f   : > { %693 = vrot.lane.b32.xlu0 %v3473_v22, %s3317_s26  ;;  %v1425_v37 = vrot.slane %v622_v23, 6  ;;  %v3566_v40 = vrot.slane %v3473_v22, 6 }
  0xa6   : > { %629 = vrot.lane.b32.xlu2 %v622_v23, %s4303_s27  ;;  %724 = vrot.lane.b32.xlu1 %v622_v23, %s3319_s28 }
  0xa7   : > { %751 = vrot.lane.b32.xlu0 %v3473_v22, %s4300_s29 }
  0xae   : > { %662 = vperm.xlu2 %3294, %v510_v24   ;;  %627 = vrot.lane.b32.xlu1 %v3473_v22, %s4303_s27  ;;  %s3326_s27 = smov 120  }
  0xaf   : > { %945 = vrot.lane.b32.xlu0 %v846_v25, %s3319_s28 }
  0xb6   : > { %882 = vrot.lane.b32.xlu2 %v846_v25, %s4299_s23  ;;  %695 = vrot.lane.b32.xlu1 %v622_v23, %s3317_s26  ;;  %s3329_s23 = smov 56  }
  0xb7   : > { %973 = vrot.lane.b32.xlu0 %v3493_v26, %s3314_s20 }
  0xbe   : > { %1009 = vrot.lane.b32.xlu2 %v846_v25, %s4302_s30  ;;  %753 = vrot.lane.b32.xlu1 %v622_v23, %s4300_s29  ;;  %s3330_s29 = smov 64   ;;  %s4316_s30 = smov 127  }
  0xbf   : > { %912 = vrot.lane.b32.xlu0 %v845_v27, %s3317_s26 }
  0xc6   : > { %849 = vrot.lane.b32.xlu2 %v846_v25, %s4308_s16  ;;  %910 = vrot.lane.b32.xlu1 %v3493_v26, %s3313_s19 }
  0xc7   : > { %977 = vrot.lane.b32.xlu0 %v846_v25, %s4306_s17 }
  0xce   : > { %975 = vrot.lane.b32.xlu2 %v845_v27, %s4306_s17  ;;  %847 = vrot.lane.b32.xlu1 %v845_v27, %s4308_s16  ;;  %s4310_s17 = smov 57   ;;  %s4311_s16 = smov 72  }
  0xcf   : > { %1172 = vrot.lane.b32.xlu0 %v1136_v28, %s4305_s21  ;;  %s4314_s21 = smov 24  }
  0xd6   : > { %840 = vperm.xlu2 %3294, %v515_v29   ;;  %914 = vrot.lane.b32.xlu1 %v846_v25, %s3317_s26 }
  0xd7   : > { %1235 = vrot.lane.b32.xlu0 %v1136_v28, %s3319_s28 }
  0xde   : > { %1263 = vrot.lane.b32.xlu2 %v3527_v31, %s3314_s20  ;;  %834 = vperm.xlu1 %3295, %v513_v32  }
  0xdf   : > { %1137 = vrot.lane.b32.xlu0 %v1135_v33, %s3326_s27 }
  0xe6   : > { %1070 = vrot.lane.b32.xlu2 %v3539_v34, %s3313_s19  ;;  %1299 = vrot.lane.b32.xlu1 %v1136_v28, %s4310_s17  ;;  %s3331_s17 = smov 122  }
  0xe7   : > { %1202 = vrot.lane.b32.xlu0 %v1135_v33, %s3317_s26 }
  0xee   : > { %1072 = vrot.lane.b32.xlu2 %v3548_v35, %s3313_s19  ;;  %1200 = vrot.lane.b32.xlu1 %v3527_v31, %s3313_s19 }
  0xef   : > { %1267 = vrot.lane.b32.xlu0 %v1136_v28, %s4311_s16 }
  0xf6   : > { %1265 = vrot.lane.b32.xlu2 %v1135_v33, %s4311_s16  ;;  %1139 = vrot.lane.b32.xlu1 %v1136_v28, %s3326_s27  ;;  %s4313_s16 = smov 32  }
  0xf7   : > { %1458 = vrot.lane.b32.xlu0 %v1425_v37, %s3317_s26 }
  0xf8   : > { %v783_v38 = vpop.permute.xlu2 %782 }
  0xf9   : > { %3113 = vmatpush.msk.msrb.mxu1 %vm637_vm2, %v783_v38 }
  0xfa   : > { %3114 = vmatmul.msk.f32.vlgmr.msrb.gmra.mxu1 %vm633_vm3, %v3561_v39 }
  0xfe   : > { %1456 = vrot.lane.b32.xlu2 %v3566_v40, %s3317_s26  ;;  %1204 = vrot.lane.b32.xlu1 %v1136_v28, %s3317_s26 }
  0xff   : > { %1551 = vrot.lane.b32.xlu0 %v1425_v37, %s3329_s23 }
 0x100   : > { %v630_v41 = vpop.permute.xlu2 %629 }
 0x106   : > { %1426 = vrot.lane.b32.xlu1 %v1425_v37, %s3330_s29  ;;  %1454 = vrot.lane.b32.xlu2 %v3575_v42, %s3313_s19 }
 0x107   : > { %1519 = vrot.lane.b32.xlu0 %v3566_v40, %s3330_s29 }
 0x108   : > { %v3582_v43 = vpop.permute.xlu2 %662 }
 0x10e   : > { %1489 = vrot.lane.b32.xlu1 %v1425_v37, %s3319_s28  ;;  %1358 = vrot.lane.b32.xlu2 %v3539_v34, %s3314_s20 }
 0x10f   : > { %605 = vperm.xlu0 %3293, %v508_v44  }
 0x110   : > { %v667_v45 = vpop.permute.xlu1 %666  ;;  %v883_v46 = vpop.permute.xlu2 %882 }
 0x111   : > { %v694_v47 = vpop.permute.xlu0 %693  ;;  %3105 = vmatpush.msk.msrb.mxu3 %vm637_vm2, %v667_v45 }
 0x112   : > { %3106 = vmatmul.msk.f32.vlgmr.msrb.gmra.mxu3 %vm633_vm3, %v3451_v8 }
 0x116   : > { %533 = vperm.xlu2 %3294, %v506_v48   ;;  %1517 = vrot.lane.b32.xlu1 %v3575_v42, %s3314_s20  ;;  %v595_v48 = vpop.f32.mrf.mxu3 }
 0x117   : > { %1612 = vrot.lane.b32.xlu0 %v3548_v35, %s3331_s17 }
 0x118   : > { %v725_v49 = vpop.permute.xlu1 %724  ;;  %v1010_v50 = vpop.permute.xlu2 %1009 }
 0x119   : > { %v752_v51 = vpop.permute.xlu0 %751  ;;  %3109 = vmatpush.msk.msra.mxu3 %vm637_vm2, %v725_v49 }
 0x11a   : > { %3110 = vmatmul.msk.f32.vlgmr.msra.gmra.mxu3 %vm633_vm3, %v3554_v36 }
 0x11e   : > { %1610 = vrot.lane.b32.xlu2 %v3539_v34, %s3331_s17  ;;  %1360 = vrot.lane.b32.xlu1 %v3548_v35, %s3314_s20  ;;  %s3333_s17 = smov 118   ;;  %s4317_s20 = smov 112  }
 0x120   : > { %v850_v52 = vpop.permute.xlu2 %849  ;;  %v628_v53 = vpop.permute.xlu1 %627 }
 0x121   : > { %v946_v54 = vpop.permute.xlu0 %945  ;;  %v632_v55 = vsel %vm631_vm4, %v628_v53, %v630_v41 }
 0x122   : > { %3103 = vmatpush.msk.msra.mxu2 %vm637_vm2, %v632_v55 }
 0x123   : > { %3104 = vmatmul.msk.f32.vlgmr.msra.gmra.mxu2 %vm633_vm3, %v3451_v8 }
 0x128   : > { %v696_v56 = vpop.permute.xlu1 %695  ;;  %v976_v57 = vpop.permute.xlu2 %975 }
 0x129   : > { %v3609_v58 = vpop.permute.xlu0 %973  ;;  %v698_v59 = vsel %vm697_vm5, %v694_v47, %v696_v56  ;;  %v514_v56 = vld [vmem:[%s4294_s11 + $0x8] sm:$0xf] }
 0x12a   : > { %3107 = vmatpush.msk.msrb.mxu2 %vm637_vm2, %v698_v59 }
 0x12b   : > { %3108 = vmatmul.msk.f32.vlgmr.msrb.gmra.mxu2 %vm633_vm3, %v3554_v36 }
 0x12c   : > { %825 = vmatpush.msra.mxu2 %v3615_v60 }
 0x12e   : > { %826 = vmatpush.msra.mxu2 %v3623_v61 }
 0x130   : > { %3122 = vmatpush.msk.msrb.mxu2 %vm637_vm2, %v946_v54  ;;  %v754_v62 = vpop.permute.xlu1 %753  ;;  %v3628_v63 = vpop.permute.xlu2 %840 }
 0x131   : > { %v913_v0 = vpop.permute.xlu0 %912  ;;  %v756_v1 = vsel %vm755_vm6, %v752_v51, %v754_v62 }
 0x132   : > { %3111 = vmatpush.msk.msrb.mxu0 %vm637_vm2, %v756_v1 }
 0x133   : > { %3112 = vmatmul.msk.f32.vlgmr.msrb.gmra.mxu0 %vm633_vm3, %v3561_v39 }
 0x134   : > { %3118 = vmatpush.msk.msra.mxu0 %vm637_vm2, %v883_v46 }
 0x136   : > { %3126 = vmatpush.msk.msrb.mxu0 %vm637_vm2, %v1010_v50 }
 0x138   : > { %v3636_v2 = vpop.permute.xlu1 %910  ;;  %v3638_v3 = vpop.permute.xlu2 %1263 }
 0x139   : > { %v978_v4 = vpop.permute.xlu0 %977 }
 0x13a   : > { %v980_v12 = vsel %vm979_vm8, %v976_v57, %v978_v4 }
 0x13b   : > { %3119 = vmatmul.msk.f32.vlgmr.msra.gmra.mxu0 %vm633_vm3, %v3493_v26 }
 0x140   : > { %v848_v6 = vpop.permute.xlu1 %847  ;;  %v3642_v7 = vpop.permute.xlu2 %1070 }
 0x141   : > { %v1173_v10 = vpop.permute.xlu0 %1172  ;;  %v852_v11 = vsel %vm851_vm7, %v848_v6, %v850_v52 }
 0x142   : > { %3116 = vmatpush.msk.msrb.mxu3 %vm637_vm2, %v852_v11 }
 0x143   : > { %3117 = vmatmul.msk.f32.vlgmr.msrb.gmra.mxu3 %vm633_vm3, %v3493_v26  ;;  %3127 = vmatmul.msk.f32.vlgmr.msrb.gmra.mxu0 %vm633_vm3, %v3609_v58 }
 0x144   : > { %3124 = vmatpush.msk.msra.mxu3 %vm637_vm2, %v980_v12 }
 0x148   : > { %v915_v13 = vpop.permute.xlu1 %914  ;;  %v3656_v18 = vpop.permute.xlu2 %1072 }
 0x149   : > { %v3652_v14 = vpop.permute.xlu0 %1235  ;;  %v916_v16 = vsel %vm697_vm5, %v913_v0, %v915_v13 }
 0x14a   : > { %3120 = vmatpush.msk.msra.mxu1 %vm637_vm2, %v916_v16 }
 0x14b   : > { %3121 = vmatmul.msk.f32.vlgmr.msra.gmra.mxu1 %vm633_vm3, %v3636_v2  ;;  %3125 = vmatmul.msk.f32.vlgmr.msra.gmra.mxu3 %vm633_vm3, %v3609_v58 }
 0x14c   : > { %1055 = vmatpush.msrb.mxu1 %v3615_v60 }
 0x14e   : > { %1056 = vmatpush.msrb.mxu1 %v3623_v61 }
 0x150   : > { %3137 = vmatpush.msk.msra.mxu1 %vm637_vm2, %v1173_v10  ;;  %v3665_v20 = vpop.permute.xlu1 %834  ;;  %v1266_v22 = vpop.permute.xlu2 %1265 }
 0x151   : > { %v1138_v21 = vpop.permute.xlu0 %1137 }
 0x158   : > { %v3667_v23 = vpop.permute.xlu1 %1299  ;;  %v1457_v25 = vpop.permute.xlu2 %1456 }
 0x159   : > { %v1203_v24 = vpop.permute.xlu0 %1202 }
 0x160   : > { %v3669_v26 = vpop.permute.xlu1 %1200  ;;  %v3674_v29 = vpop.permute.xlu2 %1454 }
 0x161   : > { %v1268_v27 = vpop.permute.xlu0 %1267 }
 0x162   : > { %v3672_v28 = vsel %vm1269_vm9, %v1266_v22, %v1268_v27  ;;  %v516_v27 = vld [vmem:[%s4295_s12 + $0x8] sm:$0xf] }
 0x168   : > { %v1140_v32 = vpop.permute.xlu1 %1139  ;;  %v3683_v45 = vpop.permute.xlu2 %1358 }
 0x169   : > { %v1459_v33 = vpop.permute.xlu0 %1458  ;;  %v1142_v37 = vsel %vm1141_vm10, %v1138_v21, %v1140_v32  ;;  %v3731_v32 = vpop.f32.mrf.mxu0 }
 0x16a   : > { %3135 = vmatpush.msk.msra.mxu0 %vm637_vm2, %v1142_v37  ;;  %v1460_v46 = vsel %vm697_vm5, %v1457_v25, %v1459_v33 }
 0x16b   : > { %3136 = vmatmul.msk.f32.vlgmr.msra.gmra.mxu0 %vm633_vm3, %v3527_v31 }
 0x170   : > { %v1205_v38 = vpop.permute.xlu1 %1204  ;;  %v3694_v49 = vpop.permute.xlu2 %533 }
 0x171   : > { %v3680_v41 = vpop.permute.xlu0 %1551  ;;  %v1206_v44 = vsel %vm697_vm5, %v1203_v24, %v1205_v38  ;;  %v596_v50 = vadd.f32 %v595_v48, %v3694_v49 }
 0x172   : > { %3139 = vmatpush.msk.msrb.mxu0 %vm637_vm2, %v1206_v44 }
 0x173   : > { %3140 = vmatmul.msk.f32.vlgmr.msrb.gmra.mxu0 %vm633_vm3, %v3669_v26 }
 0x174   : > { %1345 = vmatpush.msra.mxu0 %v3615_v60 }
 0x176   : > { %1346 = vmatpush.msra.mxu0 %v3623_v61 }
 0x177   : > { %v803_v0 = vpop.f32.mrf.mxu1 }
 0x178   : > { %3155 = vmatpush.msk.msrb.mxu0 %vm637_vm2, %v1460_v46  ;;  %v1427_v6 = vpop.permute.xlu1 %1426  ;;  %v3722_v13 = vpop.permute.xlu2 %1610 }
 0x179   : > { %v3692_v47 = vpop.permute.xlu0 %1519 }
 0x180   : > { %v3716_v10 = vpop.permute.xlu1 %1489 }
 0x181   : > { %v3697_v51 = vpop.permute.xlu0 %605 }
 0x182   : > { %v611_v52 = vmul.f32 %v3697_v51, %v596_v50 }
 0x184   : > { %v615_v53 = vmax.f32 %v596_v50, %v611_v52 }
 0x186   : > { %v3701_v54 = vmul.f32 %v3470_v19, %v615_v53 }
 0x188   : > { %1671 = vrot.lane.b32.xlu2 %v3701_v54, %s3313_s19  ;;  %v1764_v55 = vrot.slane %v3701_v54, 2  ;;  %v3718_v11 = vpop.permute.xlu1 %1517 }
 0x18a   : > { %1765 = vrot.lane.b32.xlu1 %v1764_v55, %s3319_s28 }
 0x190   : > { %1708 = vperm.xlu2 %3294, %v514_v56   ;;  %v3720_v12 = vpop.permute.xlu1 %1360 }
 0x192   : > { %1667 = vrot.lane.b32.xlu1 %v3701_v54, %s4316_s30  ;;  %s4324_s30 = smov 63  }
 0x195   : > { %v687_v57 = vpop.f32.mrf.mxu3 }
 0x196   : > { %v690_v59 = vadd.f32 %v687_v57, %v3582_v43 }
 0x19d   : > { %v745_v62 = vpop.f32.mrf.mxu3 }
 0x19e   : > { %v748_v1 = vadd.f32 %v745_v62, %v690_v59 }
 0x1a0   : > { %v806_v4 = vadd.f32 %v803_v0, %v748_v1 }
 0x1a2   : > { %3115 = vmatmul.msk.f32.vlgmr.msra.gmra.mxu2 %vm807_vm11, %v806_v4 }
 0x1a6   : > { %v657_v33 = vpop.f32.mrf.mxu2 }
 0x1a7   : > { %v665_v44 = vadd.f32 %v3582_v43, %v657_v33 }
 0x1aa   : > { %3123 = vmatmul.msk.f32.vlgmr.msrb.gmra.mxu2 %vm633_vm3, %v3636_v2 }
 0x1ae   : > { %v720_v38 = vpop.f32.mrf.mxu2 }
 0x1af   : > { %v723_v46 = vadd.f32 %v720_v38, %v665_v44 }
 0x1b0   : > { %v778_v37 = vpop.f32.mrf.mxu0 }
 0x1b1   : > { %v781_v48 = vadd.f32 %v778_v37, %v723_v46 }
 0x1b8   : > { %v903_v50 = vpop.f32.mrf.mxu0 }
 0x1b9   : > { %v907_v56 = vrot.slane %v903_v50, 6 }
 0x1bb   : > { %v909_v1 = vadd.f32 %v907_v56, %v3582_v43 }
 0x1c0   : > { %v1030_v62 = vpop.f32.mrf.mxu0 }
 0x1c1   : > { %v1034_v4 = vrot.slane %v1030_v62, 6 }
 0x1c8   : > { %v938_v33 = vpop.f32.mrf.mxu1 }
 0x1c9   : > { %v942_v38 = vrot.slane %v938_v33, 6 }
 0x1e2   : > { %v1672_v24 = vpop.permute.xlu2 %1671 }
 0x1fc   : > { %v3724_v16 = vpop.permute.xlu1 %1765 }
 0x204   : > { %v1668_v21 = vpop.permute.xlu1 %1667 }
 0x205   : > { %v1670_v22 = vmax.f32 %v3701_v54, %v1668_v21 }
 0x207   : > { %v1674_v25 = vmax.f32 %v1670_v22, %v1672_v24 }
 0x209   : > { %1676 = vrot.lane.b32.xlu0 %v1674_v25, %s4315_s25 }
 0x211   : > { %1715 = vperm.xlu0 %3293, %v516_v27   ;;  %v1522_v27 = vsel %vm1521_vm12, %v3692_v47, %v1427_v6 }
 0x219   : > { %1802 = vrot.lane.b32.xlu0 %v3539_v34, %s3333_s17 }
 0x225   : > { %v828_v52 = vpop.f32.mrf.mxu2 }
 0x226   : > { %v831_v53 = vadd.f32 %v828_v52, %v781_v48 }
 0x228   : > { %v837_v55 = vmul.f32 %v3665_v20, %v831_v53 }
 0x22a   : > { %v843_v57 = vadd.f32 %v3628_v63, %v837_v55 }
 0x22c   : > { %v844_v59 = vmax.f32 %v843_v57, 0.0 }
 0x22d   : > { %v966_v0 = vpop.f32.mrf.mxu2 }
 0x22e   : > { %v970_v21 = vrot.slane %v966_v0, 6  ;;  %3132 = vmatpush.msk.msrb.mxu3 %vm637_vm2, %v844_v59 }
 0x22f   : > { %3133 = vmatmul.msk.f32.vlgmr.msrb.gmra.mxu3 %vm633_vm3, %v3539_v34 }
 0x230   : > { %v972_v22 = vadd.f32 %v970_v21, %v909_v1  ;;  %3145 = vmatpush.msk.msra.mxu3 %vm637_vm2, %v3667_v23  ;;  %v875_v23 = vpop.f32.mrf.mxu3 }
 0x231   : > { %v879_v47 = vrot.slane %v875_v23, 6 }
 0x232   : > { %3153 = vmatpush.msk.msrb.mxu3 %vm637_vm2, %v1427_v6  ;;  %v1036_v24 = vadd.f32 %v1034_v4, %v972_v22 }
 0x233   : > { %v881_v37 = vadd.f32 %v879_v47, %v3582_v43 }
 0x234   : > { %v1038_v25 = vrot.slane %v1036_v24, 2 }
 0x235   : > { %v944_v46 = vadd.f32 %v942_v38, %v881_v37 }
 0x236   : > { %3128 = vmatmul.msk.f32.vlgmr.msrb.gmra.mxu1 %vm807_vm11, %v1038_v25 }
 0x237   : > { %3141 = vmatpush.msk.msrb.mxu1 %vm637_vm2, %v3652_v14  ;;  %3134 = vmatmul.msk.f32.gmra.mxu3 %vm633_vm3, %v3548_v35 }
 0x238   : > { %v1002_v6 = vpop.f32.mrf.mxu3 }
 0x239   : > { %v1006_v44 = vrot.slane %v1002_v6, 6 }
 0x23b   : > { %v1008_v52 = vadd.f32 %v1006_v44, %v944_v46 }
 0x23e   : > { %3138 = vmatmul.msk.f32.vlgmr.msra.gmra.mxu1 %vm633_vm3, %v3527_v31  ;;  %v3763_v31 = vpop.permute.xlu0 %1612 }
 0x23f   : > { %3146 = vmatmul.msk.f32.vlgmr.msra.gmra.mxu3 %vm633_vm3, %v3638_v3 }
 0x240   : > { %3159 = vmatpush.msk.msra.mxu3 %vm637_vm2, %v1522_v27 }
 0x246   : > { %3142 = vmatmul.msk.f32.vlgmr.msrb.gmra.mxu1 %vm633_vm3, %v3669_v26 }
 0x247   : > { %3154 = vmatmul.msk.f32.vlgmr.msrb.gmra.mxu3 %vm633_vm3, %v3575_v42 }
 0x248   : > { %1694 = vmatpush.msrb.mxu3 %v3615_v60 }
 0x24a   : > { %1695 = vmatpush.msrb.mxu3 %v3623_v61 }
 0x24f   : > { %3160 = vmatmul.msk.f32.vlgmr.msra.gmra.mxu3 %vm633_vm3, %v3718_v11 }
 0x27b   : > { %v1677_v14 = vpop.permute.xlu0 %1676 }
 0x27c   : > { %3167 = vmatmul.msk.f32.vlgmr.msrb.gmra.mxu3 %vm807_vm11, %v1677_v14 }
 0x2b2   : > { %v3767_v48 = vpop.f32.mrf.mxu3 }
 0x2b3   : > { %v1058_v50 = vpop.f32.mrf.mxu1 }
 0x2b4   : > { %v1062_v53 = vrot.slane %v1058_v50, 6 }
 0x2b6   : > { %v1064_v55 = vadd.f32 %v1062_v53, %v1008_v52 }
 0x2b8   : > { %v1065_v56 = vmul.f32 %v1064_v55, %v3665_v20 }
 0x2ba   : > { %v1066_v57 = vadd.f32 %v1065_v56, %v3628_v63  ;;  %v3771_v59 = vpop.f32.mrf.mxu3 }
 0x2bb   : > { %v1193_v62 = vpop.f32.mrf.mxu1 }
 0x2bc   : > { %v1067_v0 = vmax.f32 %v1066_v57, 0.0  ;;  %v1197_v4 = vrot.slane %v1193_v62, 4 }
 0x2be   : > { %v1075_v1 = vrot.slane %v1067_v0, 2  ;;  %v1199_v24 = vadd.f32 %v1197_v4, %v3582_v43 }
 0x2c0   : > { %3129 = vmatpush.msk.msra.mxu2 %vm637_vm2, %v1075_v1 }
 0x2c1   : > { %3130 = vmatmul.msk.f32.vlgmr.msra.gmra.mxu2 %vm633_vm3, %v3642_v7 }
 0x2c2   : > { %3143 = vmatpush.msk.msrb.mxu2 %vm637_vm2, %v3672_v28  ;;  %v1320_v21 = vpop.f32.mrf.mxu3 }
 0x2c3   : > { %v1256_v22 = vpop.f32.mrf.mxu1  ;;  %v1324_v25 = vrot.slane %v1320_v21, 4 }
 0x2c4   : > { %3151 = vmatpush.msk.msra.mxu2 %vm637_vm2, %v3566_v40  ;;  %v1260_v27 = vrot.slane %v1256_v22, 4  ;;  %v1165_v40 = vpop.f32.mrf.mxu0 }
 0x2c5   : > { %v1169_v33 = vrot.slane %v1165_v40, 4 }
 0x2c6   : > { %v1262_v14 = vadd.f32 %v1260_v27, %v1199_v24 }
 0x2c8   : > { %v1326_v23 = vadd.f32 %v1324_v25, %v1262_v14 }
 0x2c9   : > { %3131 = vmatmul.msk.f32.gmra.mxu2 %vm633_vm3, %v3656_v18 }
 0x2ca   : > { %v1328_v47 = vrot.slane %v1326_v23, 4  ;;  %v1447_v22 = vpop.f32.mrf.mxu3 }
 0x2cb   : > { %v1451_v27 = vrot.slane %v1447_v22, 2 }
 0x2cc   : > { %3147 = vmatmul.msk.f32.vlgmr.msra.gmra.mxu0 %vm807_vm11, %v1328_v47 }
 0x2cd   : > { %3161 = vmatpush.msk.msra.mxu0 %vm637_vm2, %v3680_v41  ;;  %v1228_v41 = vpop.f32.mrf.mxu0  ;;  %v1453_v40 = vadd.f32 %v1451_v27, %v3582_v43 }
 0x2ce   : > { %v1232_v37 = vrot.slane %v1228_v41, 4 }
 0x2d1   : > { %3144 = vmatmul.msk.f32.vlgmr.msrb.gmra.mxu2 %vm633_vm3, %v3638_v3 }
 0x2d2   : > { %3157 = vmatpush.msk.msrb.mxu2 %vm637_vm2, %v3716_v10  ;;  %v1171_v10 = vadd.f32 %v1169_v33, %v3582_v43 }
 0x2d4   : > { %3156 = vmatmul.msk.f32.vlgmr.msrb.gmra.mxu0 %vm633_vm3, %v3674_v29  ;;  %v1234_v46 = vadd.f32 %v1232_v37, %v1171_v10  ;;  %v1864_v10 = vld.sshfl [vmem:[#allocation1] sm:$0xff pattern:$0x75316420] }
 0x2d9   : > { %3152 = vmatmul.msk.f32.vlgmr.msra.gmra.mxu2 %vm633_vm3, %v3575_v42 }
 0x2dc   : > { %3162 = vmatmul.msk.f32.vlgmr.msra.gmra.mxu0 %vm633_vm3, %v3718_v11 }
 0x2e1   : > { %3158 = vmatmul.msk.f32.vlgmr.msrb.gmra.mxu2 %vm633_vm3, %v3674_v29 }
 0x344   : > { %v1099_v28 = vpop.f32.mrf.mxu2 }
 0x349   : > { %v1348_v38 = vpop.f32.mrf.mxu0 }
 0x34a   : > { %v1352_v52 = vrot.slane %v1348_v38, 4 }
 0x34c   : > { %v1102_v6 = vpop.f32.mrf.mxu2 }
 0x351   : > { %v1482_v55 = vpop.f32.mrf.mxu0 }
 0x352   : > { %v1486_v1 = vrot.slane %v1482_v55, 2  ;;  %v1544_v55 = vpop.f32.mrf.mxu3 }
 0x354   : > { %v1292_v44 = vpop.f32.mrf.mxu2 }
 0x355   : > { %v1296_v50 = vrot.slane %v1292_v44, 4  ;;  %v1130_v44 = vadd.f32 %v3767_v48, %v1099_v28  ;;  %v573_v28 = vadd.f32 %v3731_v32, %v3694_v49 }
 0x357   : > { %v1298_v42 = vadd.f32 %v1296_v50, %v1234_v46 }
 0x359   : > { %v1354_v53 = vadd.f32 %v1352_v52, %v1298_v42  ;;  %v1572_v47 = vpop.f32.mrf.mxu0  ;;  %v1133_v52 = vadd.f32 %v3771_v59, %v1102_v6  ;;  %v1865_v59 = vld.sshfl [vmem:[#allocation1 + $0x8] sm:$0xff pattern:$0x75316420]  ;;  %v610_v6 = vmul.f32 %v3697_v51, %v573_v28 }
 0x35a   : > { %v1576_v33 = vrot.slane %v1572_v47, 2 }
 0x35b   : > { %v1355_v56 = vmul.f32 %v1354_v53, %v3665_v20 }
 0x35c   : > { %v1418_v57 = vpop.f32.mrf.mxu2 }
 0x35d   : > { %v1356_v62 = vadd.f32 %v1355_v56, %v3628_v63  ;;  %v1422_v0 = vrot.slane %v1418_v57, 2  ;;  %v1548_v56 = vrot.slane %v1544_v55, 2 }
 0x35f   : > { %v1357_v4 = vmax.f32 %v1356_v62, 0.0  ;;  %v1424_v21 = vadd.f32 %v1422_v0, %v3582_v43 }
 0x361   : > { %v1363_v24 = vrot.slane %v1357_v4, 4  ;;  %v1488_v25 = vadd.f32 %v1486_v1, %v1424_v21 }
 0x363   : > { %3148 = vmatpush.msk.msra.mxu1 %vm637_vm2, %v1363_v24  ;;  %v1550_v62 = vadd.f32 %v1548_v56, %v1488_v25  ;;  %v614_v25 = vmax.f32 %v573_v28, %v610_v6 }
 0x364   : > { %3149 = vmatmul.msk.f32.vlgmr.msra.gmra.mxu1 %vm633_vm3, %v3683_v45  ;;  %v1510_v14 = vpop.f32.mrf.mxu2 }
 0x365   : > { %1597 = vmatpush.msrb.mxu1 %v3615_v60  ;;  %v1514_v23 = vrot.slane %v1510_v14, 2  ;;  %v3841_v27 = vmul.f32 %v3467_v17, %v614_v25 }
 0x367   : > { %1598 = vmatpush.msrb.mxu1 %v3623_v61  ;;  %v1516_v41 = vadd.f32 %v1514_v23, %v1453_v40  ;;  %v3845_v40 = vpop.permute.xlu2 %1708 }
 0x369   : > { %1783 = vmatpush.msra.mxu1 %v3615_v60  ;;  %v1578_v37 = vadd.f32 %v1576_v33, %v1516_v41  ;;  %v3849_v41 = vpop.permute.xlu0 %1715 }
 0x36b   : > { %1784 = vmatpush.msra.mxu1 %v3623_v61  ;;  %v1580_v38 = vrot.slane %v1578_v37, 6 }
 0x36c   : > { %3150 = vmatmul.msk.f32.gmra.mxu1 %vm633_vm3, %v3720_v12 }
 0x374   : > { %3163 = vmatmul.msk.f32.vlgmr.msrb.gmra.mxu1 %vm807_vm11, %v1580_v38 }
 0x375   : > { %3176 = vmatpush.msk.msrb.mxu1 %vm547_vm0, %v1864_v10 }
 0x37c   : > { %3171 = vmatmul.msk.f32.vlgmr.msra.gmra.mxu1 %vm807_vm11, %v3724_v16 }
 0x384   : > { %3177 = vmatmul.msk.f32.vlgmr.msrb.gmra.mxu1 %vm540_vm1, %v3439_v5 }
 0x38c   : > { %3178 = vmatmul.msk.f32.gmra.mxu1 %vm540_vm1, %v3518_v30 }
 0x3e1   : > { %v1387_v46 = vpop.f32.mrf.mxu1 }
 0x3e2   : > { %v1393_v50 = vadd.f32 %v1387_v46, %v1130_v44 }
 0x3e9   : > { %v1390_v42 = vpop.f32.mrf.mxu1 }
 0x3ea   : > { %v1394_v53 = vadd.f32 %v1390_v42, %v1133_v52 }
 0x3f1   : > { %v1600_v57 = vpop.f32.mrf.mxu1 }
 0x3f2   : > { %v1604_v0 = vrot.slane %v1600_v57, 2 }
 0x3f4   : > { %v1606_v16 = vadd.f32 %v1604_v0, %v1550_v62 }
 0x3f6   : > { %v1607_v1 = vmul.f32 %v1606_v16, %v3665_v20 }
 0x3f8   : > { %v1608_v4 = vadd.f32 %v1607_v1, %v3628_v63 }
 0x3f9   : > { %v1786_v21 = vpop.f32.mrf.mxu1 }
 0x3fa   : > { %v1609_v22 = vmax.f32 %v1608_v4, 0.0  ;;  %v1790_v24 = vrot.slane %v1786_v21, 6 }
 0x3fc   : > { %v1615_v48 = vrot.slane %v1609_v22, 6  ;;  %1791 = vrot.lane.b32.xlu1 %v1790_v24, %s4313_s16  ;;  %s4320_s16 = smov 80  }
 0x3fe   : > { %3164 = vmatpush.msk.msra.mxu2 %vm637_vm2, %v1615_v48 }
 0x3ff   : > { %3165 = vmatmul.msk.f32.vlgmr.msra.gmra.mxu2 %vm633_vm3, %v3722_v13 }
 0x400   : > { %3179 = vmatpush.msk.msrb.mxu2 %vm547_vm0, %v1865_v59 }
 0x407   : > { %3166 = vmatmul.msk.f32.gmra.mxu2 %vm633_vm3, %v3763_v31 }
 0x40f   : > { %3180 = vmatmul.msk.f32.vlgmr.msrb.gmra.mxu2 %vm540_vm1, %v3439_v5 }
 0x417   : > { %3181 = vmatmul.msk.f32.gmra.mxu2 %vm540_vm1, %v3518_v30 }
 0x46e   : > { %v1792_v14 = vpop.permute.xlu1 %1791 }
 0x46f   : > { %v1794_v23 = vadd.f32 %v1792_v14, %v3841_v27  ;;  %v1795_v47 = vadd.f32 %v1792_v14, %v3701_v54 }
 0x471   : > { %v1796_v5 = vmul.f32 %v1794_v23, %v3845_v40  ;;  %v1797_v30 = vmul.f32 %v1795_v47, %v3845_v40 }
 0x473   : > { %v1799_v32 = vadd.f32 %v1797_v30, %v3849_v41  ;;  %v1798_v33 = vadd.f32 %v1796_v5, %v3849_v41 }
 0x475   : > { %v1801_v37 = vmax.f32 %v1799_v32, 0.0  ;;  %v1800_v38 = vmax.f32 %v1798_v33, 0.0 }
 0x477   : > { %v1809_v10 = vrot.slane %v1801_v37, 2  ;;  %v1808_v44 = vrot.slane %v1800_v38, 2 }
 0x479   : > { %1812 = vrot.lane.b32.xlu2 %v1809_v10, %s3317_s26  ;;  %1810 = vrot.lane.b32.xlu1 %v1808_v44, %s3317_s26 }
 0x481   : > { %1804 = vrot.lane.b32.xlu1 %v3548_v35, %s3333_s17  ;;  %s4319_s17 = smov 58  }
 0x482   : > { %v1639_v46 = vpop.f32.mrf.mxu2 }
 0x483   : > { %v3857_v52 = vadd.f32 %v1639_v46, %v1393_v50  ;;  %v1697_v50 = vpop.f32.mrf.mxu3 }
 0x48a   : > { %v1642_v42 = vpop.f32.mrf.mxu2 }
 0x48b   : > { %v3859_v55 = vadd.f32 %v1642_v42, %v1394_v53  ;;  %v1887_v53 = vpop.f32.mrf.mxu1 }
 0x48c   : > { %v1888_v1 = vadd.f32 %v1887_v53, %v3457_v9 }
 0x48e   : > { %v1916_v4 = vmul.f32 %v1888_v1, %v3464_v15 }
 0x490   : > { %v1920_v21 = vmax.f32 %v1888_v1, %v1916_v4 }
 0x492   : > { %v1910_v56 = vpop.f32.mrf.mxu2  ;;  %v3888_v22 = vmul.f32 %v1920_v21, %v3467_v17 }
 0x493   : > { %v1911_v57 = vadd.f32 %v1910_v56, %v3457_v9  ;;  %v1890_v47 = vpop.f32.mrf.mxu1 }
 0x494   : > { %v3900_v9 = vrot.slane %v3888_v22, 2  ;;  %v3918_v6 = vrot.slane %v3888_v22, 4  ;;  %v1891_v5 = vadd.f32 %v1890_v47, %v3694_v49  ;;  %v3939_v32 = vrot.slane %v3888_v22, 6 }
 0x495   : > { %v1917_v62 = vmul.f32 %v1911_v57, %v3464_v15 }
 0x496   : > { %v1918_v30 = vmul.f32 %v1891_v5, %v3697_v51 }
 0x497   : > { %v1921_v0 = vmax.f32 %v1911_v57, %v1917_v62 }
 0x498   : > { %v1922_v37 = vmax.f32 %v1891_v5, %v1918_v30 }
 0x499   : > { %v3864_v16 = vmul.f32 %v1921_v0, %v3470_v19 }
 0x49a   : > { %v1913_v33 = vpop.f32.mrf.mxu2  ;;  %v3951_v46 = vmul.f32 %v1922_v37, %v3467_v17 }
 0x49b   : > { %2064 = vrot.lane.b32.xlu0 %v3864_v16, %s3315_s24  ;;  %1958 = vrot.lane.b32.xlu2 %v3864_v16, %s4315_s25  ;;  %s4318_s24 = smov 104   ;;  %v3893_v24 = vrot.slane %v3864_v16, 2  ;;  %v3905_v15 = vrot.slane %v3864_v16, 4  ;;  %v3928_v23 = vrot.slane %v3864_v16, 6  ;;  %v1914_v38 = vadd.f32 %v1913_v33, %v3694_v49  ;;  %s4323_s25 = smov 62  }
 0x49c   : > { %2011 = vrot.lane.b32.xlu1 %v3864_v16, %s3319_s28 }
 0x49d   : > { %v1919_v42 = vmul.f32 %v1914_v38, %v3697_v51 }
 0x49f   : > { %v1923_v49 = vmax.f32 %v1914_v38, %v1919_v42 }
 0x4a1   : > { %v3960_v53 = vmul.f32 %v1923_v49, %v3470_v19 }
 0x4a3   : > { %1651 = vrot.lane.b32.xlu0 %v3701_v54, %s3326_s27  ;;  %1649 = vrot.lane.b32.xlu2 %v3841_v27, %s3326_s27 }
 0x4a4   : > { %1658 = vrot.lane.b32.xlu1 %v3841_v27, %s4317_s20 }
 0x4ab   : > { %1701 = vrot.lane.b32.xlu0 %v1697_v50, %s4314_s21  ;;  %1660 = vrot.lane.b32.xlu2 %v3701_v54, %s4317_s20  ;;  %s4322_s21 = smov 88  }
 0x4b3   : > { %1722 = vrot.lane.b32.xlu0 %v3539_v34, %s3326_s27  ;;  %v3909_v34 = vpop.permute.xlu0 %1802 }
 0x4bb   : > { %1932 = vrot.lane.b32.xlu0 %v3864_v16, %s4318_s24 }
 0x4c3   : > { %1983 = vrot.lane.b32.xlu0 %v3888_v22, %s3317_s26 }
 0x4cb   : > { %2267 = vrot.lane.b32.xlu0 %v3893_v24, %s4319_s17  ;;  %s4321_s17 = smov 72  }
 0x4d3   : > { %2179 = vrot.lane.b32.xlu0 %v3893_v24, %s3317_s26  ;;  %v1813_v48 = vpop.permute.xlu2 %1812 }
 0x4db   : > { %2236 = vrot.lane.b32.xlu0 %v3900_v9, %s4320_s16 }
 0x4e3   : > { %2471 = vrot.lane.b32.xlu0 %v3905_v15, %s3319_s28 }
 0x4eb   : > { %2383 = vrot.lane.b32.xlu0 %v3905_v15, %s3326_s27  ;;  %v1811_v59 = vpop.permute.xlu1 %1810 }
 0x4ec   : > { %v1814_v28 = vsel %vm697_vm5, %v1811_v59, %v1813_v48 }
 0x4ed   : > { %3172 = vmatpush.msk.msra.mxu3 %vm637_vm2, %v1814_v28 }
 0x4ee   : > { %3173 = vmatmul.msk.f32.vlgmr.msra.gmra.mxu3 %vm633_vm3, %v3909_v34 }
 0x4f3   : > { %2499 = vrot.lane.b32.xlu0 %v3918_v6, %s4321_s17  ;;  %v3922_v25 = vpop.permute.xlu1 %1804 }
 0x4f5   : > { %v1959_v14 = vpop.permute.xlu2 %1958 }
 0x4f6   : > { %3174 = vmatmul.msk.f32.gmra.mxu3 %vm633_vm3, %v3922_v25 }
 0x4f7   : > { %3184 = vmatpush.msk.msrb.mxu3 %vm637_vm2, %v1959_v14 }
 0x4fb   : > { %2676 = vrot.lane.b32.xlu0 %v3928_v23, %s3317_s26 }
 0x4fd   : > { %v1650_v44 = vpop.permute.xlu2 %1649 }
 0x4fe   : > { %3185 = vmatmul.msk.f32.vlgmr.msrb.gmra.mxu3 %vm633_vm3, %v3451_v8 }
 0x503   : > { %2705 = vrot.lane.b32.xlu0 %v3928_v23, %s3319_s28 }
 0x505   : > { %v1661_v1 = vpop.permute.xlu2 %1660 }
 0x50b   : > { %2733 = vrot.lane.b32.xlu0 %v3939_v32, %s3330_s29 }
 0x50d   : > { %v2065_v10 = vpop.permute.xlu0 %2064 }
 0x50e   : > { %v2012_v8 = vpop.permute.xlu1 %2011  ;;  %3192 = vmatpush.msk.msra.mxu3 %vm637_vm2, %v2065_v10 }
 0x50f   : > { %3188 = vmatpush.msk.msra.mxu1 %vm637_vm2, %v2012_v8  ;;  %3193 = vmatmul.msk.f32.vlgmr.msra.gmra.mxu3 %vm633_vm3, %v3561_v39 }
 0x510   : > { %3189 = vmatmul.msk.f32.vlgmr.msra.gmra.mxu1 %vm633_vm3, %v3554_v36 }
 0x513   : > { %2852 = vrot.lane.b32.xlu0 %v3951_v46, %s3326_s27 }
 0x515   : > { %v1652_v56 = vpop.permute.xlu0 %1651 }
 0x516   : > { %v1653_v57 = vsel %vm1141_vm10, %v1650_v44, %v1652_v56  ;;  %v1657_v0 = vmax.f32 %v3701_v54, %v1652_v56  ;;  %v1659_v50 = vpop.permute.xlu1 %1658 }
 0x517   : > { %v1656_v62 = vmax.f32 %v3841_v27, %v1653_v57  ;;  %v1662_v17 = vsel %vm851_vm7, %v1659_v50, %v1661_v1  ;;  %v3296_v50 = vld [vmem:[%s4288_s5] sm:$0x3] }
 0x518   : > { %v1666_v4 = vmax.f32 %v1657_v0, %v1661_v1 }
 0x519   : > { %v1665_v51 = vmax.f32 %v1656_v62, %v1662_v17 }
 0x51b   : > { %2863 = vrot.lane.b32.xlu0 %v3960_v53, %s4317_s20 }
 0x51d   : > { %v1702_v21 = vpop.permute.xlu0 %1701 }
 0x51e   : > { %v1704_v48 = vadd.f32 %v1702_v21, %v1665_v51  ;;  %v1705_v59 = vadd.f32 %v1702_v21, %v1666_v4 }
 0x520   : > { %v1711_v28 = vmul.f32 %v3845_v40, %v1704_v48  ;;  %v1712_v27 = vmul.f32 %v3845_v40, %v1705_v59 }
 0x522   : > { %v1719_v54 = vadd.f32 %v3849_v41, %v1712_v27  ;;  %v1718_v19 = vadd.f32 %v3849_v41, %v1711_v28 }
 0x524   : > { %v1721_v14 = vmax.f32 %v1719_v54, 0.0  ;;  %v1720_v47 = vmax.f32 %v1718_v19, 0.0 }
 0x526   : > { %1730 = vrot.lane.b32.xlu2 %v1721_v14, %s4318_s24  ;;  %1728 = vrot.lane.b32.xlu1 %v1720_v47, %s4318_s24 }
 0x52e   : > { %1930 = vrot.lane.b32.xlu2 %v3888_v22, %s4318_s24  ;;  %1724 = vrot.lane.b32.xlu1 %v3548_v35, %s3326_s27  ;;  %v4007_v35 = vpop.permute.xlu0 %1722 }
 0x536   : > { %2038 = vrot.lane.b32.xlu2 %v3864_v16, %s4322_s21  ;;  %2036 = vrot.lane.b32.xlu1 %v3888_v22, %s4322_s21  ;;  %s4327_s21 = smov 61  }
 0x53e   : > { %2149 = vrot.lane.b32.xlu2 %v3893_v24, %s4323_s25  ;;  %1985 = vrot.lane.b32.xlu1 %v3864_v16, %s3317_s26  ;;  %s4325_s25 = smov 57   ;;  %v1933_v16 = vpop.permute.xlu0 %1932 }
 0x546   : > { %2177 = vrot.lane.b32.xlu2 %v3900_v9, %s3317_s26  ;;  %2208 = vrot.lane.b32.xlu1 %v3893_v24, %s3319_s28 }
 0x54e   : > { %2120 = vrot.lane.b32.xlu2 %v3893_v24, %s4317_s20  ;;  %2118 = vrot.lane.b32.xlu1 %v3900_v9, %s4317_s20  ;;  %v1984_v9 = vpop.permute.xlu0 %1983 }
 0x556   : > { %2412 = vrot.lane.b32.xlu2 %v3905_v15, %s4324_s30  ;;  %2238 = vrot.lane.b32.xlu1 %v3893_v24, %s4320_s16  ;;  %s4326_s30 = smov 127   ;;  %v2949_v24 = vrot.slane %v3960_v53, 2 }
 0x55e   : > { %2381 = vrot.lane.b32.xlu2 %v3918_v6, %s3326_s27  ;;  %2530 = vrot.lane.b32.xlu1 %v3905_v15, %s4325_s25 }
 0x566   : > { %2442 = vrot.lane.b32.xlu2 %v3905_v15, %s3317_s26  ;;  %2440 = vrot.lane.b32.xlu1 %v3918_v6, %s3317_s26  ;;  %v2268_v6 = vpop.permute.xlu0 %2267 }
 0x56e   : > { %2674 = vrot.lane.b32.xlu2 %v3939_v32, %s3317_s26  ;;  %2501 = vrot.lane.b32.xlu1 %v3905_v15, %s4321_s17  ;;  %v2180_v33 = vpop.permute.xlu0 %2179 }
 0x571   : > { %v4022_v38 = vpop.f32.mrf.mxu3 }
 0x576   : > { %2646 = vrot.lane.b32.xlu2 %v3928_v23, %s3330_s29  ;;  %2762 = vrot.lane.b32.xlu1 %v3928_v23, %s3329_s23  ;;  %v2237_v49 = vpop.permute.xlu0 %2236 }
 0x579   : > { %v4037_v56 = vpop.f32.mrf.mxu3 }
 0x57e   : > { %2874 = vrot.lane.b32.xlu2 %v3960_v53, %s3313_s19  ;;  %2870 = vrot.lane.b32.xlu1 %v3960_v53, %s4326_s30  ;;  %v4050_v1 = vpop.permute.xlu0 %2471 }
 0x580   : > { %v1731_v22 = vpop.permute.xlu2 %1730 }
 0x581   : > { %v1979_v17 = vpop.f32.mrf.mxu3 }
 0x582   : > { %v1982_v59 = vadd.f32 %v1979_v17, %v3582_v43 }
 0x586   : > { %2950 = vrot.lane.b32.xlu1 %v2949_v24, %s3319_s28  ;;  %v2384_v27 = vpop.permute.xlu0 %2383  ;;  %v4079_v24 = vld [vmem:[%s4290_s7] sm:$0x3] }
 0x588   : > { %v1931_v15 = vpop.permute.xlu2 %1930 }
 0x589   : > { %v1934_v10 = vsel %vm631_vm4, %v1931_v15, %v1933_v16 }
 0x58d   : > { %v2032_v48 = vpop.f32.mrf.mxu1 }
 0x58e   : > { %2854 = vrot.lane.b32.xlu1 %v3960_v53, %s3326_s27  ;;  %v2035_v54 = vadd.f32 %v2032_v48, %v1982_v59 }
 0x590   : > { %v2039_v5 = vpop.permute.xlu2 %2038 }
 0x592   : > { %v2085_v28 = vpop.f32.mrf.mxu3 }
 0x593   : > { %v2088_v47 = vadd.f32 %v2085_v28, %v2035_v54 }
 0x598   : > { %v2150_v23 = vpop.permute.xlu2 %2149  ;;  %v1729_v30 = vpop.permute.xlu1 %1728 }
 0x599   : > { %v1732_v37 = vsel %vm631_vm4, %v1729_v30, %v1731_v22 }
 0x59a   : > { %3168 = vmatpush.msk.msrb.mxu0 %vm637_vm2, %v1732_v37 }
 0x59b   : > { %3169 = vmatmul.msk.f32.vlgmr.msrb.gmra.mxu0 %vm633_vm3, %v4007_v35 }
 0x59c   : > { %3182 = vmatpush.msk.msra.mxu0 %vm637_vm2, %v1934_v10 }
 0x5a0   : > { %v2178_v8 = vpop.permute.xlu2 %2177  ;;  %v4029_v44 = vpop.permute.xlu1 %1724 }
 0x5a1   : > { %v2181_v42 = vsel %vm697_vm5, %v2178_v8, %v2180_v33 }
 0x5a2   : > { %3199 = vmatpush.msk.msrb.mxu3 %vm637_vm2, %v2181_v42 }
 0x5a3   : > { %3170 = vmatmul.msk.f32.gmra.mxu0 %vm633_vm3, %v4029_v44  ;;  %3200 = vmatmul.msk.f32.vlgmr.msrb.gmra.mxu3 %vm633_vm3, %v3636_v2 }
 0x5a4   : > { %2313 = vmatpush.msra.mxu3 %v3615_v60 }
 0x5a6   : > { %2314 = vmatpush.msra.mxu3 %v3623_v61 }
 0x5a8   : > { %v2121_v57 = vpop.permute.xlu2 %2120  ;;  %v2037_v62 = vpop.permute.xlu1 %2036 }
 0x5a9   : > { %v2040_v0 = vsel %vm755_vm6, %v2037_v62, %v2039_v5 }
 0x5aa   : > { %3190 = vmatpush.msk.msra.mxu2 %vm637_vm2, %v2040_v0 }
 0x5ab   : > { %3183 = vmatmul.msk.f32.vlgmr.msra.gmra.mxu0 %vm633_vm3, %v3296_v50  ;;  %3191 = vmatmul.msk.f32.vlgmr.msra.gmra.mxu2 %vm633_vm3, %v3561_v39  ;;  %v3297_v39 = vld [vmem:[%s4289_s6] sm:$0x3] }
 0x5ac   : > { %3197 = vmatpush.msk.msrb.mxu2 %vm637_vm2, %v2150_v23  ;;  %v4087_v23 = vpop.permute.xlu0 %2499 }
 0x5ae   : > { %3205 = vmatpush.msk.msra.mxu2 %vm637_vm2, %v2268_v6 }
 0x5b0   : > { %v2413_v51 = vpop.permute.xlu2 %2412  ;;  %v1986_v4 = vpop.permute.xlu1 %1985 }
 0x5b1   : > { %v1987_v21 = vsel %vm697_vm5, %v1984_v9, %v1986_v4  ;;  %3216 = vmatpush.msk.msrb.mxu3 %vm637_vm2, %v2413_v51 }
 0x5b2   : > { %3186 = vmatpush.msk.msrb.mxu0 %vm637_vm2, %v1987_v21 }
 0x5b3   : > { %3187 = vmatmul.msk.f32.vlgmr.msrb.gmra.mxu0 %vm633_vm3, %v3554_v36  ;;  %3198 = vmatmul.msk.f32.vlgmr.msrb.gmra.mxu2 %vm633_vm3, %v3297_v39 }
 0x5b4   : > { %2106 = vmatpush.msra.mxu0 %v3615_v60  ;;  %v2677_v37 = vpop.permute.xlu0 %2676 }
 0x5b6   : > { %2107 = vmatpush.msra.mxu0 %v3623_v61 }
 0x5b8   : > { %v2382_v19 = vpop.permute.xlu2 %2381  ;;  %v2209_v14 = vpop.permute.xlu1 %2208 }
 0x5b9   : > { %v2385_v36 = vsel %vm1141_vm10, %v2382_v19, %v2384_v27  ;;  %3201 = vmatpush.msk.msrb.mxu0 %vm637_vm2, %v2209_v14 }
 0x5ba   : > { %3214 = vmatpush.msk.msrb.mxu2 %vm637_vm2, %v2385_v36 }
 0x5bb   : > { %3194 = vmatmul.msk.f32.vlgmr.msra.gmra.mxu0 %vm807_vm11, %v2088_v47  ;;  %3206 = vmatmul.msk.f32.vlgmr.msra.gmra.mxu2 %vm633_vm3, %v3609_v58 }
 0x5c0   : > { %v2119_v16 = vpop.permute.xlu1 %2118  ;;  %v2443_v5 = vpop.permute.xlu2 %2442 }
 0x5c1   : > { %v2122_v22 = vsel %vm851_vm7, %v2119_v16, %v2121_v57 }
 0x5c2   : > { %3195 = vmatpush.msk.msrb.mxu1 %vm637_vm2, %v2122_v22 }
 0x5c3   : > { %3196 = vmatmul.msk.f32.vlgmr.msrb.gmra.mxu1 %vm633_vm3, %v3297_v39  ;;  %3202 = vmatmul.msk.f32.vlgmr.msrb.gmra.mxu0 %vm633_vm3, %v3636_v2 }
 0x5c4   : > { %3215 = vmatmul.msk.f32.vlgmr.msrb.gmra.mxu2 %vm633_vm3, %v4079_v24 }
 0x5c8   : > { %v2239_v9 = vpop.permute.xlu1 %2238  ;;  %v2675_v33 = vpop.permute.xlu2 %2674 }
 0x5c9   : > { %v2240_v15 = vsel %vm979_vm8, %v2237_v49, %v2239_v9  ;;  %v2678_v10 = vsel %vm697_vm5, %v2675_v33, %v2677_v37  ;;  %v3299_v9 = vld [vmem:[%s4296_s13] sm:$0xff]  ;;  %v3300_v37 = vld [vmem:[%s4296_s13 + $0x8] sm:$0xf] }
 0x5ca   : > { %3203 = vmatpush.msk.msra.mxu1 %vm637_vm2, %v2240_v15 }
 0x5cb   : > { %3204 = vmatmul.msk.f32.vlgmr.msra.gmra.mxu1 %vm633_vm3, %v3609_v58 }
 0x5d0   : > { %v2531_v6 = vpop.permute.xlu1 %2530  ;;  %v2647_v8 = vpop.permute.xlu2 %2646 }
 0x5d8   : > { %v2441_v2 = vpop.permute.xlu1 %2440  ;;  %v2875_v62 = vpop.permute.xlu2 %2874 }
 0x5d9   : > { %v2444_v30 = vsel %vm697_vm5, %v2441_v2, %v2443_v5 }
 0x5da   : > { %3218 = vmatpush.msk.msra.mxu2 %vm637_vm2, %v2444_v30  ;;  %v2706_v30 = vpop.permute.xlu0 %2705 }
 0x5db   : > { %3219 = vmatmul.msk.f32.vlgmr.msra.gmra.mxu2 %vm633_vm3, %v3669_v26 }
 0x5dc   : > { %2576 = vmatpush.msrb.mxu2 %v3615_v60 }
 0x5de   : > { %2577 = vmatpush.msrb.mxu2 %v3623_v61 }
 0x5e0   : > { %3234 = vmatpush.msk.msra.mxu2 %vm637_vm2, %v2678_v10  ;;  %v4097_v58 = vpop.permute.xlu1 %2501 }
 0x5e2   : > { %v2734_v10 = vpop.permute.xlu0 %2733 }
 0x5e8   : > { %v4099_v42 = vpop.permute.xlu1 %2762 }
 0x5f0   : > { %v2871_v49 = vpop.permute.xlu1 %2870 }
 0x5f1   : > { %v2873_v57 = vmax.f32 %v3960_v53, %v2871_v49 }
 0x5f3   : > { %v2877_v0 = vmax.f32 %v2873_v57, %v2875_v62 }
 0x5f5   : > { %2879 = vrot.lane.b32.xlu2 %v2877_v0, %s4327_s21  ;;  %s4328_s21 = smov 24  }
 0x5fd   : > { %2861 = vrot.lane.b32.xlu2 %v3951_v46, %s4317_s20 }
 0x618   : > { %v1756_v60 = vpop.f32.mrf.mxu0 }
 0x619   : > { %v4106_v61 = vadd.f32 %v1756_v60, %v3857_v52 }
 0x620   : > { %v1759_v50 = vpop.f32.mrf.mxu0 }
 0x621   : > { %v4109_v17 = vadd.f32 %v1759_v50, %v3859_v55 }
 0x626   : > { %v2201_v60 = vpop.f32.mrf.mxu3 }
 0x628   : > { %v1954_v51 = vpop.f32.mrf.mxu0 }
 0x629   : > { %v1957_v39 = vadd.f32 %v1954_v51, %v3582_v43 }
 0x62e   : > { %v2060_v4 = vpop.f32.mrf.mxu2 }
 0x630   : > { %v2007_v21 = vpop.f32.mrf.mxu0 }
 0x631   : > { %v2010_v48 = vadd.f32 %v2007_v21, %v1957_v39 }
 0x633   : > { %v2063_v28 = vadd.f32 %v2060_v4, %v2010_v48  ;;  %v2205_v4 = vrot.slane %v2201_v60, 6 }
 0x636   : > { %v2170_v59 = vpop.f32.mrf.mxu2 }
 0x637   : > { %v2174_v14 = vrot.slane %v2170_v59, 6 }
 0x638   : > { %v2109_v27 = vpop.f32.mrf.mxu0 }
 0x639   : > { %v2112_v54 = vadd.f32 %v2109_v27, %v2063_v28  ;;  %v2176_v55 = vadd.f32 %v2174_v14, %v3582_v43 }
 0x63b   : > { %v2113_v19 = vmul.f32 %v2112_v54, %v3665_v20 }
 0x63d   : > { %v2114_v52 = vadd.f32 %v2113_v19, %v3628_v63 }
 0x63e   : > { %v2288_v36 = vpop.f32.mrf.mxu2 }
 0x63f   : > { %v2115_v47 = vmax.f32 %v2114_v52, 0.0  ;;  %v2292_v15 = vrot.slane %v2288_v36, 6 }
 0x640   : > { %v2229_v16 = vpop.f32.mrf.mxu0  ;;  %v2142_v49 = vpop.f32.mrf.mxu1 }
 0x641   : > { %v2233_v22 = vrot.slane %v2229_v16, 6  ;;  %3211 = vmatpush.msk.msrb.mxu1 %vm637_vm2, %v2115_v47  ;;  %v2146_v0 = vrot.slane %v2142_v49, 6 }
 0x642   : > { %3212 = vmatmul.msk.f32.vlgmr.msrb.gmra.mxu1 %vm633_vm3, %v3299_v9 }
 0x643   : > { %v2235_v5 = vadd.f32 %v2233_v22, %v2176_v55  ;;  %3224 = vmatpush.msk.msra.mxu1 %vm637_vm2, %v2531_v6  ;;  %v2735_v6 = vsel %vm1521_vm12, %v2734_v10, %v2647_v8  ;;  %v2148_v50 = vadd.f32 %v2146_v0, %v3582_v43  ;;  %v2503_v22 = vsel %vm1269_vm9, %v4087_v23, %v4097_v58 }
 0x645   : > { %3232 = vmatpush.msk.msrb.mxu1 %vm637_vm2, %v2647_v8  ;;  %v2294_v2 = vadd.f32 %v2292_v15, %v2235_v5  ;;  %v4150_v8 = vld [vmem:[%s4293_s10] sm:$0xff]  ;;  %v2207_v39 = vadd.f32 %v2205_v4, %v2148_v50 }
 0x647   : > { %v2296_v33 = vrot.slane %v2294_v2, 2 }
 0x648   : > { %v2260_v57 = vpop.f32.mrf.mxu1 }
 0x649   : > { %3207 = vmatmul.msk.f32.vlgmr.msra.gmra.mxu3 %vm807_vm11, %v2296_v33  ;;  %v2264_v21 = vrot.slane %v2260_v57, 6 }
 0x64a   : > { %3220 = vmatpush.msk.msra.mxu3 %vm637_vm2, %v4050_v1  ;;  %3213 = vmatmul.msk.f32.gmra.mxu1 %vm633_vm3, %v3300_v37  ;;  %v3301_v1 = vld [vmem:[%s4291_s8] sm:$0x3] }
 0x64b   : > { %v2266_v59 = vadd.f32 %v2264_v21, %v2207_v39 }
 0x651   : > { %3217 = vmatmul.msk.f32.vlgmr.msrb.gmra.mxu3 %vm633_vm3, %v4079_v24  ;;  %v4144_v24 = vld [vmem:[%s4293_s10 + $0x8] sm:$0xff] }
 0x652   : > { %3225 = vmatmul.msk.f32.vlgmr.msra.gmra.mxu1 %vm633_vm3, %v3638_v3 }
 0x653   : > { %3238 = vmatpush.msk.msra.mxu1 %vm637_vm2, %v2735_v6 }
 0x659   : > { %3221 = vmatmul.msk.f32.vlgmr.msra.gmra.mxu3 %vm633_vm3, %v3669_v26  ;;  %v2880_v26 = vpop.permute.xlu2 %2879 }
 0x65a   : > { %3233 = vmatmul.msk.f32.vlgmr.msrb.gmra.mxu1 %vm633_vm3, %v3301_v1 }
 0x65b   : > { %2897 = vmatpush.msrb.mxu1 %v4144_v24 }
 0x65d   : > { %2898 = vmatpush.msrb.mxu1 %v4150_v8 }
 0x662   : > { %3239 = vmatmul.msk.f32.vlgmr.msra.gmra.mxu1 %vm633_vm3, %v3718_v11 }
 0x66a   : > { %3246 = vmatmul.msk.f32.vlgmr.msrb.gmra.mxu1 %vm807_vm11, %v2880_v26 }
 0x6bf   : > { %v4156_v62 = vpop.f32.mrf.mxu1 }
 0x6c7   : > { %v4159_v51 = vpop.f32.mrf.mxu1 }
 0x6cc   : > { %v2316_v48 = vpop.f32.mrf.mxu3 }
 0x6cd   : > { %v2320_v28 = vrot.slane %v2316_v48, 6 }
 0x6cf   : > { %v2322_v27 = vadd.f32 %v2320_v28, %v2266_v59  ;;  %v2551_v54 = vpop.f32.mrf.mxu1 }
 0x6d0   : > { %v2555_v2 = vrot.slane %v2551_v54, 4 }
 0x6d1   : > { %v2323_v19 = vmul.f32 %v2322_v27, %v3665_v20 }
 0x6d3   : > { %v2324_v14 = vadd.f32 %v2323_v19, %v3628_v63 }
 0x6d4   : > { %v2433_v52 = vpop.f32.mrf.mxu3 }
 0x6d5   : > { %v2325_v47 = vmax.f32 %v2324_v14, 0.0  ;;  %v2437_v55 = vrot.slane %v2433_v52, 4 }
 0x6d7   : > { %v2327_v36 = vrot.slane %v2325_v47, 2  ;;  %v4163_v16 = vpop.f32.mrf.mxu1  ;;  %v2439_v15 = vadd.f32 %v2437_v55, %v3582_v43 }
 0x6d9   : > { %3208 = vmatpush.msk.msra.mxu0 %vm637_vm2, %v2327_v36 }
 0x6da   : > { %3209 = vmatmul.msk.f32.vlgmr.msra.gmra.mxu0 %vm633_vm3, %v3642_v7 }
 0x6db   : > { %3222 = vmatpush.msk.msrb.mxu0 %vm637_vm2, %v2503_v22 }
 0x6dc   : > { %v2492_v9 = vpop.f32.mrf.mxu3 }
 0x6dd   : > { %3230 = vmatpush.msk.msra.mxu0 %vm637_vm2, %v3939_v32  ;;  %v2496_v5 = vrot.slane %v2492_v9, 4  ;;  %v2853_v32 = vpop.permute.xlu0 %2852  ;;  %v519_v9 = vld [vmem:[%s4297_s14] sm:$0xff] }
 0x6df   : > { %v2498_v33 = vadd.f32 %v2496_v5, %v2439_v15  ;;  %v4175_v37 = vpop.f32.mrf.mxu1 }
 0x6e1   : > { %v2557_v10 = vadd.f32 %v2555_v2, %v2498_v33 }
 0x6e2   : > { %3210 = vmatmul.msk.f32.gmra.mxu0 %vm633_vm3, %v3656_v18  ;;  %v4193_v18 = vpop.permute.xlu1 %2950 }
 0x6e3   : > { %v2559_v23 = vrot.slane %v2557_v10, 4 }
 0x6e5   : > { %3226 = vmatmul.msk.f32.vlgmr.msrb.gmra.mxu2 %vm807_vm11, %v2559_v23  ;;  %v2864_v6 = vpop.permute.xlu0 %2863 }
 0x6e6   : > { %3240 = vmatpush.msk.msrb.mxu2 %vm637_vm2, %v4099_v42  ;;  %v2862_v42 = vpop.permute.xlu2 %2861 }
 0x6e7   : > { %v2900_v7 = vpop.f32.mrf.mxu1  ;;  %v2865_v26 = vsel %vm851_vm7, %v2862_v42, %v2864_v6 }
 0x6e8   : > { %2904 = vrot.lane.b32.xlu1 %v2900_v7, %s4328_s21 }
 0x6ea   : > { %3223 = vmatmul.msk.f32.vlgmr.msrb.gmra.mxu0 %vm633_vm3, %v3638_v3  ;;  %v2855_v58 = vpop.permute.xlu1 %2854 }
 0x6eb   : > { %3236 = vmatpush.msk.msrb.mxu0 %vm637_vm2, %v2706_v30  ;;  %v2856_v3 = vsel %vm1141_vm10, %v2853_v32, %v2855_v58  ;;  %v2860_v30 = vmax.f32 %v3960_v53, %v2855_v58 }
 0x6ed   : > { %3235 = vmatmul.msk.f32.vlgmr.msra.gmra.mxu2 %vm633_vm3, %v3674_v29  ;;  %v2869_v0 = vmax.f32 %v2860_v30, %v2864_v6  ;;  %v2759_v6 = vrot.slane %v4175_v37, 2 }
 0x6f2   : > { %3231 = vmatmul.msk.f32.vlgmr.msra.gmra.mxu0 %vm633_vm3, %v3301_v1  ;;  %v2859_v1 = vmax.f32 %v3951_v46, %v2856_v3 }
 0x6f4   : > { %v2868_v57 = vmax.f32 %v2859_v1, %v2865_v26 }
 0x6f5   : > { %3241 = vmatmul.msk.f32.vlgmr.msrb.gmra.mxu2 %vm633_vm3, %v3718_v11  ;;  %v2405_v11 = vpop.f32.mrf.mxu2 }
 0x6f6   : > { %v2409_v19 = vrot.slane %v2405_v11, 4  ;;  %v2671_v11 = vrot.slane %v4163_v16, 2 }
 0x6f8   : > { %v2411_v52 = vadd.f32 %v2409_v19, %v3582_v43  ;;  %v2673_v37 = vadd.f32 %v2671_v11, %v3582_v43 }
 0x6fa   : > { %3237 = vmatmul.msk.f32.vlgmr.msrb.gmra.mxu0 %vm633_vm3, %v3674_v29 }
 0x6fd   : > { %v2464_v28 = vpop.f32.mrf.mxu2 }
 0x6fe   : > { %v2468_v14 = vrot.slane %v2464_v28, 4 }
 0x700   : > { %v2470_v36 = vadd.f32 %v2468_v14, %v2411_v52 }
 0x757   : > { %v4199_v49 = vpop.f32.mrf.mxu0 }
 0x75a   : > { %v2905_v29 = vpop.permute.xlu1 %2904 }
 0x75b   : > { %v2907_v60 = vadd.f32 %v2905_v29, %v2868_v57  ;;  %v2908_v50 = vadd.f32 %v2905_v29, %v2869_v0 }
 0x75d   : > { %v2909_v4 = vmul.f32 %v2907_v60, %v3845_v40  ;;  %v2910_v21 = vmul.f32 %v2908_v50, %v3845_v40 }
 0x75f   : > { %v4203_v39 = vpop.f32.mrf.mxu0  ;;  %v2912_v48 = vadd.f32 %v2910_v21, %v3849_v41  ;;  %v2911_v59 = vadd.f32 %v2909_v4, %v3849_v41 }
 0x761   : > { %v2914_v27 = vmax.f32 %v2912_v48, 0.0  ;;  %v2913_v54 = vmax.f32 %v2911_v59, 0.0 }
 0x763   : > { %2919 = vrot.lane.b32.xlu1 %v2914_v27, %s4318_s24  ;;  %2917 = vrot.lane.b32.xlu0 %v2913_v54, %s4318_s24  ;;  %s3259_s24 = sshll.u32 %s4331_s22, 4  ;;  %s4329_s22 = smov 32  }
 0x764   : > { %s4241_s19 = scalar_lea.vmem %s4298_s15, %s3259_s24 }
 0x767   : > { %v2523_v47 = vpop.f32.mrf.mxu0 }
 0x768   : > { %v2527_v55 = vrot.slane %v2523_v47, 4  ;;  %v2579_v22 = vpop.f32.mrf.mxu2 }
 0x769   : > { %v2583_v15 = vrot.slane %v2579_v22, 4 }
 0x76a   : > { %v2529_v5 = vadd.f32 %v2527_v55, %v2470_v36 }
 0x76b   : > { %1848 = vperm.xlu1 %3295, %v519_v9  }
 0x76c   : > { %v2585_v2 = vadd.f32 %v2583_v15, %v2529_v5 }
 0x76e   : > { %v2586_v33 = vmul.f32 %v2585_v2, %v3665_v20 }
 0x76f   : > { %v2638_v10 = vpop.f32.mrf.mxu0 }
 0x770   : > { %v2587_v23 = vadd.f32 %v2586_v33, %v3628_v63  ;;  %v2642_v7 = vrot.slane %v2638_v10, 2  ;;  %v2698_v32 = vpop.f32.mrf.mxu2 }
 0x771   : > { %v2702_v58 = vrot.slane %v2698_v32, 2 }
 0x772   : > { %v2588_v42 = vmax.f32 %v2587_v23, 0.0  ;;  %v2644_v3 = vadd.f32 %v2642_v7, %v3582_v43 }
 0x774   : > { %v2590_v30 = vrot.slane %v2588_v42, 4  ;;  %v2704_v26 = vadd.f32 %v2702_v58, %v2644_v3 }
 0x776   : > { %3227 = vmatpush.msk.msrb.mxu3 %vm637_vm2, %v2590_v30  ;;  %v2761_v1 = vadd.f32 %v2759_v6, %v2704_v26 }
 0x777   : > { %3228 = vmatmul.msk.f32.vlgmr.msrb.gmra.mxu3 %vm633_vm3, %v3683_v45  ;;  %v2726_v57 = vpop.f32.mrf.mxu0 }
 0x778   : > { %2808 = vmatpush.msra.mxu3 %v4144_v24  ;;  %v2730_v0 = vrot.slane %v2726_v57, 2  ;;  %v2783_v29 = vpop.f32.mrf.mxu2 }
 0x779   : > { %v2787_v50 = vrot.slane %v2783_v29, 2 }
 0x77a   : > { %2809 = vmatpush.msra.mxu3 %v4150_v8  ;;  %v2732_v60 = vadd.f32 %v2730_v0, %v2673_v37 }
 0x77c   : > { %2968 = vmatpush.msrb.mxu3 %v4144_v24  ;;  %v2789_v45 = vadd.f32 %v2787_v50, %v2732_v60 }
 0x77e   : > { %2969 = vmatpush.msrb.mxu3 %v4150_v8  ;;  %v2791_v16 = vrot.slane %v2789_v45, 6 }
 0x77f   : > { %3229 = vmatmul.msk.f32.gmra.mxu3 %vm633_vm3, %v3720_v12  ;;  %v1844_v12 = vadd.f32 %v4022_v38, %v4106_v61  ;;  %v2377_v38 = vadd.f32 %v4159_v51, %v4203_v39 }
 0x787   : > { %3242 = vmatmul.msk.f32.vlgmr.msra.gmra.mxu3 %vm807_vm11, %v2791_v16 }
 0x78f   : > { %3250 = vmatmul.msk.f32.vlgmr.msrb.gmra.mxu3 %vm807_vm11, %v4193_v18  ;;  %v2374_v18 = vadd.f32 %v4156_v62, %v4199_v49 }
 0x7d5   : > { %v2920_v4 = vpop.permute.xlu1 %2919  ;;  %v2918_v21 = vpop.permute.xlu0 %2917 }
 0x7d6   : > { %v2921_v43 = vsel %vm631_vm4, %v2918_v21, %v2920_v4 }
 0x7d7   : > { %3247 = vmatpush.msk.msra.mxu2 %vm637_vm2, %v2921_v43 }
 0x7d8   : > { %3248 = vmatmul.msk.f32.vlgmr.msra.gmra.mxu2 %vm633_vm3, %v4007_v35 }
 0x7dd   : > { %v1849_v24 = vpop.permute.xlu1 %1848 }
 0x7de   : > { %v1856_v8 = vadd.f32 %v1849_v24, %v1844_v12 }
 0x7e0   : > { %1858 = vst [vmem:[%s4241_s19] sm:$0xff] %v1856_v8  ;;  %3249 = vmatmul.msk.f32.gmra.mxu2 %vm633_vm3, %v4029_v44 }
 0x7fa   : > { %v2610_v35 = vpop.f32.mrf.mxu3 }
 0x7fb   : > { %v2616_v48 = vadd.f32 %v2610_v35, %v2374_v18 }
 0x802   : > { %v2613_v61 = vpop.f32.mrf.mxu3 }
 0x803   : > { %v2617_v59 = vadd.f32 %v2613_v61, %v2377_v38 }
 0x80a   : > { %v2811_v28 = vpop.f32.mrf.mxu3 }
 0x80b   : > { %v2815_v27 = vrot.slane %v2811_v28, 2 }
 0x80d   : > { %v2817_v54 = vadd.f32 %v2815_v27, %v2761_v1 }
 0x80f   : > { %v2818_v19 = vmul.f32 %v2817_v54, %v3665_v20 }
 0x811   : > { %v2819_v14 = vadd.f32 %v2818_v19, %v3628_v63 }
 0x812   : > { %v2971_v52 = vpop.f32.mrf.mxu3 }
 0x813   : > { %v2820_v47 = vmax.f32 %v2819_v14, 0.0  ;;  %v2975_v44 = vrot.slane %v2971_v52, 6 }
 0x815   : > { %v2822_v36 = vrot.slane %v2820_v47, 6  ;;  %2976 = vrot.lane.b32.xlu2 %v2975_v44, %s4329_s22 }
 0x817   : > { %3243 = vmatpush.msk.msra.mxu0 %vm637_vm2, %v2822_v36 }
 0x818   : > { %3244 = vmatmul.msk.f32.vlgmr.msra.gmra.mxu0 %vm633_vm3, %v3722_v13 }
 0x820   : > { %3245 = vmatmul.msk.f32.gmra.mxu0 %vm633_vm3, %v3763_v31  ;;  %v520_v31 = vld [vmem:[%s4297_s14 + $0x8] sm:$0xf] }
 0x85b   : > { %v2941_v23 = vpop.f32.mrf.mxu2 }
 0x863   : > { %v2944_v3 = vpop.f32.mrf.mxu2 }
 0x86f   : > { %v2977_v62 = vpop.permute.xlu2 %2976 }
 0x870   : > { %v2979_v51 = vadd.f32 %v2977_v62, %v3951_v46  ;;  %v2980_v20 = vadd.f32 %v2977_v62, %v3960_v53 }
 0x872   : > { %v2981_v63 = vmul.f32 %v2979_v51, %v3845_v40  ;;  %v2982_v49 = vmul.f32 %v2980_v20, %v3845_v40  ;;  %v1845_v40 = vadd.f32 %v4037_v56, %v4109_v17 }
 0x874   : > { %v2983_v39 = vadd.f32 %v2981_v63, %v3849_v41  ;;  %v2984_v55 = vadd.f32 %v2982_v49, %v3849_v41 }
 0x876   : > { %v2985_v22 = vmax.f32 %v2983_v39, 0.0  ;;  %v2986_v9 = vmax.f32 %v2984_v55, 0.0 }
 0x878   : > { %v2989_v13 = vrot.slane %v2985_v22, 2  ;;  %v2990_v15 = vrot.slane %v2986_v9, 2 }
 0x87a   : > { %2991 = vrot.lane.b32.xlu2 %v2989_v13, %s3317_s26  ;;  %2993 = vrot.lane.b32.xlu0 %v2990_v15, %s3317_s26 }
 0x882   : > { %1853 = vperm.xlu2 %3294, %v520_v31  }
 0x895   : > { %v2842_v33 = vpop.f32.mrf.mxu0 }
 0x896   : > { %v2848_v10 = vadd.f32 %v2842_v33, %v2616_v48 }
 0x898   : > { %v2947_v56 = vadd.f32 %v2941_v23, %v2848_v10 }
 0x89d   : > { %v2845_v17 = vpop.f32.mrf.mxu0 }
 0x89e   : > { %v2849_v58 = vadd.f32 %v2845_v17, %v2617_v59 }
 0x8a0   : > { %v2948_v6 = vadd.f32 %v2944_v3, %v2849_v58 }
 0x8d4   : > { %v2992_v46 = vpop.permute.xlu2 %2991 }
 0x8dc   : > { %v1854_v53 = vpop.permute.xlu2 %1853 }
 0x8dd   : > { %v1857_v5 = vadd.f32 %v1854_v53, %v1845_v40 }
 0x8df   : > { %1859 = vst [vmem:[%s4241_s19 + $0x8] sm:$0xf] %v1857_v5 }
 0x8ec   : > { %v2994_v41 = vpop.permute.xlu0 %2993 }
 0x8ed   : > { %v2995_v2 = vsel %vm697_vm5, %v2992_v46, %v2994_v41 }
 0x8ee   : > { %3251 = vmatpush.msk.msra.mxu1 %vm637_vm2, %v2995_v2 }
 0x8ef   : > { %3252 = vmatmul.msk.f32.vlgmr.msra.gmra.mxu1 %vm633_vm3, %v3909_v34 }
 0x8f7   : > { %3253 = vmatmul.msk.f32.gmra.mxu1 %vm633_vm3, %v3922_v25 }
 0x96c   : > { %v3015_v7 = vpop.f32.mrf.mxu1 }
 0x96d   : > { %v3021_v32 = vadd.f32 %v3015_v7, %v2947_v56 }
 0x96f   : > { %v3023_v42 = vadd.f32 %v3021_v32, %v1849_v24 }
 0x971   : > { %3254 = vst [vmem:[%s4241_s19 + $0x10] sm:$0xff] %v3023_v42 }
 0x974   : > { %v3018_v30 = vpop.f32.mrf.mxu1 }
 0x975   : > { %v3022_v26 = vadd.f32 %v3018_v30, %v2948_v6 }
 0x977   : > { %v3024_v1 = vadd.f32 %v3022_v26, %v1854_v53 }
 0x979   : > { %3255 = vst [vmem:[%s4241_s19 + $0x18] sm:$0xf] %v3024_v1 }
 0x97a PF: > { %s25_s18 = sadd.s32 1, %s3310_s18  }
 0x97b   : > { %p22_p4 = scmp.ge.s32.totalorder %s25_s18, 4  }
 0x97d   :  { %24 = sbr.rel (!%p22_p4) target bundleno = 1 (0x1), region = 112 }

</bundles_post_ra>
